<compile_context>
chip_gen: v5e
topology: v5e:2x2
jax: 0.10.0
libtpu: 0.0.40
codegen_flags: <defaults>
</compile_context>

<pallas_src>
import functools

import jax
import jax.numpy as jnp
from jax.experimental import pallas as pl
from jax.experimental.pallas import tpu as pltpu


# ---------------------------------------------------------------------------
# Trace-time hardware choices.
# ---------------------------------------------------------------------------
def _device_kind():
    try:
        return jax.devices()[0].device_kind.lower()
    except Exception:
        return ""


def _tap_dtype():
    """bf16 elementwise tap build on v6e/v7x (native bf16 VALU); f32 on v5e
    and older chips (bf16 VALU would be emulated and slower)."""
    kind = _device_kind()
    return jnp.bfloat16 if ("v6" in kind or "v7" in kind) else jnp.float32


def _batch_dim_semantics():
    """CORE_PARALLEL on v7x so the two TensorCores each take one batch step;
    plain 'parallel' elsewhere (single-TC chips)."""
    kind = _device_kind()
    if "v7" in kind and hasattr(pltpu, "CORE_PARALLEL"):
        return (pltpu.CORE_PARALLEL,)
    return ("parallel",)


# ---------------------------------------------------------------------------
# Fused forward kernel (one grid step == Bt samples of the batch).
# ---------------------------------------------------------------------------
def _fused_forward_kernel(
    x_ref,                  # [1, Cpad, Lb]          tap_dtype (channel-major)
    mask_ref,               # [9, 1, Lb]             tap_dtype (0/1 border masks)
    w1_ref, b1_ref,         # [9, C, Cpad] bf16, [C, 1] f32
    wa_ref, ba_ref,         # [9, C, C]    bf16, [C, 1] f32
    wb_ref, bb_ref,         # [9, C, C]    bf16, [C, 1] f32
    fc1wT_ref, fc1b_ref,    # [C, hidden]  f32,  [1, hidden]  f32
    fc2wT_ref, fc2b_ref,    # [hidden, classes] f32, [1, classes] f32
    out_ref,                # [1, Bt, classes]       f32  (lane-dense)
    *, H, W, Bt, tap_dtype,
):
    P = H * W
    Lb = Bt * P

    def conv3x3(x_tap, w_ref, b_ref, relu):
        """3x3 'same' conv on channel-major activations x_tap: [Cin, Lb].

        Nine per-tap matmuls accumulated in f32.  The lane shift is a
        pltpu.roll (XLU); every wrapped / cross-sample lane is zeroed by the
        per-sample border mask, so the roll wrap-around is harmless."""
        acc = None
        for kh in range(3):
            for kw in range(3):
                t = kh * 3 + kw
                s = (kh - 1) * W + (kw - 1)          # flat tap offset
                if s == 0:
                    xt = x_tap.astype(jnp.bfloat16)  # center tap: mask is all-1
                else:
                    xs = pltpu.roll(x_tap, shift=(-s) % Lb, axis=1)
                    xt = (xs * mask_ref[t]).astype(jnp.bfloat16)
                d = jnp.dot(w_ref[t], xt,
                            preferred_element_type=jnp.float32)  # [Cout, Lb]
                acc = d if acc is None else acc + d
        acc = acc + b_ref[...]                        # f32 bias
        if relu:
            acc = jnp.maximum(acc, 0.0)
        return acc                                    # f32 [Cout, Lb]

    # ---- encoder ----
    x = x_ref[0]                                      # [Cpad, Lb] tap_dtype
    h1 = conv3x3(x, w1_ref, b1_ref, relu=True)        # [C, Lb] f32
    r = conv3x3(h1.astype(tap_dtype), wa_ref, ba_ref, relu=True)
    r = conv3x3(r.astype(tap_dtype), wb_ref, bb_ref, relu=False)
    h = jnp.maximum(r + h1, 0.0)                      # residual add + ReLU

    # ---- GAP + classifier head (f32, emits lane-dense rows) ----
    rows = []
    for b in range(Bt):                               # Bt is tiny & static
        # Per-sample GAP: static, 128-aligned lane slice (P = H*W mult of 128).
        feat = jnp.mean(h[:, b * P:(b + 1) * P], axis=1, keepdims=True)  # [C,1]
        # fc1 via broadcast-multiply + sublane reduction (no 1-row matmul).
        z = jnp.sum(fc1wT_ref[...] * feat, axis=0, keepdims=True) + fc1b_ref[...]
        z = jnp.maximum(z, 0.0)                                           # [1,hidden]
        # fc2 as a row dot -> classes on the lane axis.
        rows.append(jnp.dot(z, fc2wT_ref[...],
                            preferred_element_type=jnp.float32) + fc2b_ref[...])
    logits = rows[0] if Bt == 1 else jnp.concatenate(rows, axis=0)  # [Bt, classes]
    out_ref[0] = logits.astype(out_ref.dtype)


# ---------------------------------------------------------------------------
# Wrapper: single fused pallas_call, Bt samples per grid step.
# ---------------------------------------------------------------------------
def _resident_spec(a):
    zeros = (0,) * a.ndim
    return pl.BlockSpec(a.shape, lambda g, z=zeros: z)   # VMEM-resident weights


@jax.jit
def resnet_mlp_forward(prepared, x_nchw):
    """x_nchw: [B, Cin, H, W] (PyTorch layout) -> logits [B, num_classes]."""
    B, Cin, H, W = x_nchw.shape
    P = H * W
    Cpad = prepared["conv1_w"].shape[2]               # padded-in channel count
    num_classes = prepared["fc2_wT"].shape[1]

    # Bt samples per grid step; keep 2 steps when possible so v7x's two
    # TensorCores each take one (CORE_PARALLEL below).
    n_steps = 2 if B >= 2 else 1
    Bt = -(-B // n_steps)                             # ceil
    B_pad = n_steps * Bt
    Lb = Bt * P

    tap_dtype = _tap_dtype()

    # Channel-major, channel-padded, sample-folded activations: [n_steps, Cpad, Bt*P].
    x_f = x_nchw.reshape(B, Cin, P).astype(jnp.float32)
    if Cpad != Cin:
        x_f = jnp.pad(x_f, ((0, 0), (0, Cpad - Cin), (0, 0)))
    if B_pad != B:
        x_f = jnp.pad(x_f, ((0, B_pad - B), (0, 0), (0, 0)))
    x_grp = (x_f.reshape(n_steps, Bt, Cpad, P)
                 .transpose(0, 2, 1, 3)
                 .reshape(n_steps, Cpad, Lb)
                 .astype(tap_dtype))

    # Host-built per-sample 3x3 border-validity masks, tiled over Bt samples.
    pos = jnp.arange(P, dtype=jnp.int32)
    hh, ww = pos // W, pos % W
    masks = []
    for kh in range(3):
        for kw in range(3):
            dh, dw = kh - 1, kw - 1
            masks.append((hh + dh >= 0) & (hh + dh < H)
                         & (ww + dw >= 0) & (ww + dw < W))
    mask = jnp.stack(masks, axis=0).astype(tap_dtype)          # [9, P]
    mask = jnp.tile(mask, (1, Bt)).reshape(9, 1, Lb)           # [9, 1, Bt*P]

    out = pl.pallas_call(
        functools.partial(_fused_forward_kernel, H=H, W=W, Bt=Bt,
                          tap_dtype=tap_dtype),
        out_shape=jax.ShapeDtypeStruct((n_steps, Bt, num_classes), jnp.float32),
        grid=(n_steps,),
        in_specs=[
            pl.BlockSpec((1, Cpad, Lb), lambda g: (g, 0, 0)),
            _resident_spec(mask),
            _resident_spec(prepared["conv1_w"]), _resident_spec(prepared["conv1_b"]),
            _resident_spec(prepared["conva_w"]), _resident_spec(prepared["conva_b"]),
            _resident_spec(prepared["convb_w"]), _resident_spec(prepared["convb_b"]),
            _resident_spec(prepared["fc1_wT"]), _resident_spec(prepared["fc1_b"]),
            _resident_spec(prepared["fc2_wT"]), _resident_spec(prepared["fc2_b"]),
        ],
        out_specs=pl.BlockSpec((1, Bt, num_classes), lambda g: (g, 0, 0)),
        compiler_params=pltpu.CompilerParams(
            dimension_semantics=_batch_dim_semantics()),
    )(
        x_grp, mask,
        prepared["conv1_w"], prepared["conv1_b"],
        prepared["conva_w"], prepared["conva_b"],
        prepared["convb_w"], prepared["convb_b"],
        prepared["fc1_wT"], prepared["fc1_b"],
        prepared["fc2_wT"], prepared["fc2_b"],
    )
    return out.reshape(B_pad, num_classes)[:B]                 # [B, num_classes]


# ---------------------------------------------------------------------------
# Parameter prep (hoisted out of the jitted forward).
# ---------------------------------------------------------------------------
def prepare_params(params):
    """Re-layout weights once:
       * conv [Cout, Cin, 3, 3] -> per-tap [9, Cout, Cpad] bf16 (Cin zero-padded
         to a multiple of 8; tap order t = kh*3 + kw matches the kernel),
       * fc1 / fc2 transposed to [in, out] f32, biases as 2-D rows/columns."""
    def conv_taps(w):
        co, ci, kh, kw = w.shape
        cpad = ((ci + 7) // 8) * 8
        wt = jnp.transpose(w, (2, 3, 0, 1)).reshape(kh * kw, co, ci)
        if cpad != ci:
            wt = jnp.pad(wt, ((0, 0), (0, 0), (0, cpad - ci)))
        return wt.astype(jnp.bfloat16)

    return {
        "conv1_w": conv_taps(params["conv1_w"]),
        "conv1_b": params["conv1_b"].reshape(-1, 1).astype(jnp.float32),
        "conva_w": conv_taps(params["conva_w"]),
        "conva_b": params["conva_b"].reshape(-1, 1).astype(jnp.float32),
        "convb_w": conv_taps(params["convb_w"]),
        "convb_b": params["convb_b"].reshape(-1, 1).astype(jnp.float32),
        "fc1_wT": params["fc1_w"].T.astype(jnp.float32),              # [C, hidden]
        "fc1_b": params["fc1_b"].reshape(1, -1).astype(jnp.float32),  # [1, hidden]
        "fc2_wT": params["fc2_w"].T.astype(jnp.float32),              # [hidden, cls]
        "fc2_b": params["fc2_b"].reshape(1, -1).astype(jnp.float32),  # [1, cls]
    }


# ---------------------------------------------------------------------------
# Parameters (deterministic, synthetic).
# ---------------------------------------------------------------------------
def init_params(key, cin=4, c=8, hidden=32, num_classes=10):
    ks = jax.random.split(key, 10)

    def w_init(k, shape, fan_in):
        return jax.random.normal(k, shape, jnp.float32) / jnp.sqrt(fan_in)

    p = {}
    p["conv1_w"] = w_init(ks[0], (c, cin, 3, 3), cin * 9)
    p["conv1_b"] = w_init(ks[1], (c,), cin * 9)
    p["conva_w"] = w_init(ks[2], (c, c, 3, 3), c * 9)
    p["conva_b"] = w_init(ks[3], (c,), c * 9)
    p["convb_w"] = w_init(ks[4], (c, c, 3, 3), c * 9)
    p["convb_b"] = w_init(ks[5], (c,), c * 9)
    # PyTorch Linear weight layout is [out, in]
    p["fc1_w"] = w_init(ks[6], (hidden, c), c)
    p["fc1_b"] = w_init(ks[7], (hidden,), c)
    p["fc2_w"] = w_init(ks[8], (num_classes, hidden), hidden)
    p["fc2_b"] = w_init(ks[9], (num_classes,), hidden)
    return p


# ---------------------------------------------------------------------------
# Plain-XLA reference (f32) for the in-script correctness check.
# ---------------------------------------------------------------------------
def reference_forward(params, x_nchw):
    x = x_nchw.astype(jnp.float32)

    def conv(h, w, b):
        y = jax.lax.conv_general_dilated(
            h, w, window_strides=(1, 1), padding="SAME",
            dimension_numbers=("NCHW", "OIHW", "NCHW"))
        return y + b.reshape(1, -1, 1, 1)

    h = jax.nn.relu(conv(x, params["conv1_w"], params["conv1_b"]))
    r = jax.nn.relu(conv(h, params["conva_w"], params["conva_b"]))
    r = conv(r, params["convb_w"], params["convb_b"])
    h = jax.nn.relu(r + h)
    feat = jnp.mean(h, axis=(2, 3))                              # [B, C]
    z = jax.nn.relu(feat @ params["fc1_w"].T + params["fc1_b"])
    return z @ params["fc2_w"].T + params["fc2_b"]


if __name__ == "__main__":
    key = jax.random.PRNGKey(0)
    k_x, k_p = jax.random.split(key)

    # Small shapes consistent with the module: batch=2, channels=4, spatial=16.
    x = jax.random.normal(k_x, (2, 4, 16, 16), jnp.float32)   # NCHW like PyTorch
    params = init_params(k_p, cin=4, c=8, hidden=32, num_classes=10)
    prepared = prepare_params(params)

    logits = resnet_mlp_forward(prepared, x)
    jax.block_until_ready(logits)

    assert logits.shape == (2, 10)
    assert bool(jnp.all(jnp.isfinite(logits)))

    # Loose tolerance: conv GEMM operands are bf16 (f32 accumulation), so the
    # result is only ~1e-2-relative accurate vs the pure-f32 reference.
    ref = reference_forward(params, x)
    assert bool(jnp.allclose(logits, ref, rtol=5e-2, atol=1e-1)), (
        "mismatch vs reference: max abs err = "
        f"{float(jnp.max(jnp.abs(logits - ref)))}")

    print("KERNEL_OK")
</pallas_src>

<mosaic_0001>
module attributes {stable_mosaic.version = 11 : i64} {
  func.func @_fused_forward_kernel(%arg0: i32, %arg1: memref<1x8x256xf32, #tpu.memory_space<vmem>>, %arg2: memref<9x1x256xf32, #tpu.memory_space<vmem>>, %arg3: memref<9x8x8xbf16, #tpu.memory_space<vmem>>, %arg4: memref<8x1xf32, #tpu.memory_space<vmem>>, %arg5: memref<9x8x8xbf16, #tpu.memory_space<vmem>>, %arg6: memref<8x1xf32, #tpu.memory_space<vmem>>, %arg7: memref<9x8x8xbf16, #tpu.memory_space<vmem>>, %arg8: memref<8x1xf32, #tpu.memory_space<vmem>>, %arg9: memref<8x32xf32, #tpu.memory_space<vmem>>, %arg10: memref<1x32xf32, #tpu.memory_space<vmem>>, %arg11: memref<32x10xf32, #tpu.memory_space<vmem>>, %arg12: memref<1x10xf32, #tpu.memory_space<vmem>>, %arg13: memref<1x1x10xf32, #tpu.memory_space<vmem>>) attributes {dimension_semantics = [#tpu.dimension_semantics<parallel>], iteration_bounds = array<i64: 2>, scalar_prefetch = 0 : i64, scratch_operands = 0 : i64, tpu.core_type = #tpu.core_type<tc>, window_params = [{transform_indices = @transform_0, window_bounds = array<i64: 1, 8, 256>}, {pipeline_mode = #tpu.pipeline_mode<synchronous>, transform_indices = @transform_1, window_bounds = array<i64: 9, 1, 256>}, {pipeline_mode = #tpu.pipeline_mode<synchronous>, transform_indices = @transform_2, window_bounds = array<i64: 9, 8, 8>}, {pipeline_mode = #tpu.pipeline_mode<synchronous>, transform_indices = @transform_3, window_bounds = array<i64: 8, 1>}, {pipeline_mode = #tpu.pipeline_mode<synchronous>, transform_indices = @transform_4, window_bounds = array<i64: 9, 8, 8>}, {pipeline_mode = #tpu.pipeline_mode<synchronous>, transform_indices = @transform_5, window_bounds = array<i64: 8, 1>}, {pipeline_mode = #tpu.pipeline_mode<synchronous>, transform_indices = @transform_6, window_bounds = array<i64: 9, 8, 8>}, {pipeline_mode = #tpu.pipeline_mode<synchronous>, transform_indices = @transform_7, window_bounds = array<i64: 8, 1>}, {pipeline_mode = #tpu.pipeline_mode<synchronous>, transform_indices = @transform_8, window_bounds = array<i64: 8, 32>}, {pipeline_mode = #tpu.pipeline_mode<synchronous>, transform_indices = @transform_9, window_bounds = array<i64: 1, 32>}, {pipeline_mode = #tpu.pipeline_mode<synchronous>, transform_indices = @transform_10, window_bounds = array<i64: 32, 10>}, {pipeline_mode = #tpu.pipeline_mode<synchronous>, transform_indices = @transform_11, window_bounds = array<i64: 1, 10>}, {transform_indices = @transform_12, window_bounds = array<i64: 1, 1, 10>}]} {
    %c0 = arith.constant 0 : index
    %c0_0 = arith.constant 0 : index
    %c0_1 = arith.constant 0 : index
    %0 = vector.load %arg1[%c0, %c0_0, %c0_1] : memref<1x8x256xf32, #tpu.memory_space<vmem>>, vector<1x8x256xf32>
    %1 = vector.shape_cast %0 : vector<1x8x256xf32> to vector<8x256xf32>
    %c17_i32 = arith.constant 17 : i32
    %2 = tpu.dynamic_rotate %1 by %c17_i32 dim 1 : vector<8x256xf32>, i32 -> vector<8x256xf32>
    %c0_2 = arith.constant 0 : index
    %c0_3 = arith.constant 0 : index
    %c0_4 = arith.constant 0 : index
    %3 = vector.load %arg2[%c0_2, %c0_3, %c0_4] : memref<9x1x256xf32, #tpu.memory_space<vmem>>, vector<1x1x256xf32>
    %4 = vector.shape_cast %3 : vector<1x1x256xf32> to vector<1x256xf32>
    %5 = vector.broadcast %4 : vector<1x256xf32> to vector<8x256xf32>
    %6 = arith.mulf %2, %5 : vector<8x256xf32>
    %7 = arith.truncf %6 : vector<8x256xf32> to vector<8x256xbf16>
    %c0_5 = arith.constant 0 : index
    %c0_6 = arith.constant 0 : index
    %c0_7 = arith.constant 0 : index
    %8 = vector.load %arg3[%c0_5, %c0_6, %c0_7] : memref<9x8x8xbf16, #tpu.memory_space<vmem>>, vector<1x8x8xbf16>
    %9 = vector.shape_cast %8 : vector<1x8x8xbf16> to vector<8x8xbf16>
    %cst = arith.constant dense<0.000000e+00> : vector<8x256xf32>
    %10 = tpu.matmul %9, %7, %cst {dimension_numbers = #tpu.dot_dimension_numbers<[1], [0], [0], [1], [0, 0, 1, 1], [], []>} : vector<8x8xbf16>, vector<8x256xbf16>, vector<8x256xf32> -> vector<8x256xf32>
    %c16_i32 = arith.constant 16 : i32
    %11 = tpu.dynamic_rotate %1 by %c16_i32 dim 1 : vector<8x256xf32>, i32 -> vector<8x256xf32>
    %c1 = arith.constant 1 : index
    %c0_8 = arith.constant 0 : index
    %c0_9 = arith.constant 0 : index
    %12 = vector.load %arg2[%c1, %c0_8, %c0_9] : memref<9x1x256xf32, #tpu.memory_space<vmem>>, vector<1x1x256xf32>
    %13 = vector.shape_cast %12 : vector<1x1x256xf32> to vector<1x256xf32>
    %14 = vector.broadcast %13 : vector<1x256xf32> to vector<8x256xf32>
    %15 = arith.mulf %11, %14 : vector<8x256xf32>
    %16 = arith.truncf %15 : vector<8x256xf32> to vector<8x256xbf16>
    %c1_10 = arith.constant 1 : index
    %c0_11 = arith.constant 0 : index
    %c0_12 = arith.constant 0 : index
    %17 = vector.load %arg3[%c1_10, %c0_11, %c0_12] : memref<9x8x8xbf16, #tpu.memory_space<vmem>>, vector<1x8x8xbf16>
    %18 = vector.shape_cast %17 : vector<1x8x8xbf16> to vector<8x8xbf16>
    %cst_13 = arith.constant dense<0.000000e+00> : vector<8x256xf32>
    %19 = tpu.matmul %18, %16, %cst_13 {dimension_numbers = #tpu.dot_dimension_numbers<[1], [0], [0], [1], [0, 0, 1, 1], [], []>} : vector<8x8xbf16>, vector<8x256xbf16>, vector<8x256xf32> -> vector<8x256xf32>
    %20 = arith.addf %10, %19 : vector<8x256xf32>
    %c15_i32 = arith.constant 15 : i32
    %21 = tpu.dynamic_rotate %1 by %c15_i32 dim 1 : vector<8x256xf32>, i32 -> vector<8x256xf32>
    %c2 = arith.constant 2 : index
    %c0_14 = arith.constant 0 : index
    %c0_15 = arith.constant 0 : index
    %22 = vector.load %arg2[%c2, %c0_14, %c0_15] : memref<9x1x256xf32, #tpu.memory_space<vmem>>, vector<1x1x256xf32>
    %23 = vector.shape_cast %22 : vector<1x1x256xf32> to vector<1x256xf32>
    %24 = vector.broadcast %23 : vector<1x256xf32> to vector<8x256xf32>
    %25 = arith.mulf %21, %24 : vector<8x256xf32>
    %26 = arith.truncf %25 : vector<8x256xf32> to vector<8x256xbf16>
    %c2_16 = arith.constant 2 : index
    %c0_17 = arith.constant 0 : index
    %c0_18 = arith.constant 0 : index
    %27 = vector.load %arg3[%c2_16, %c0_17, %c0_18] : memref<9x8x8xbf16, #tpu.memory_space<vmem>>, vector<1x8x8xbf16>
    %28 = vector.shape_cast %27 : vector<1x8x8xbf16> to vector<8x8xbf16>
    %cst_19 = arith.constant dense<0.000000e+00> : vector<8x256xf32>
    %29 = tpu.matmul %28, %26, %cst_19 {dimension_numbers = #tpu.dot_dimension_numbers<[1], [0], [0], [1], [0, 0, 1, 1], [], []>} : vector<8x8xbf16>, vector<8x256xbf16>, vector<8x256xf32> -> vector<8x256xf32>
    %30 = arith.addf %20, %29 : vector<8x256xf32>
    %c1_i32 = arith.constant 1 : i32
    %31 = tpu.dynamic_rotate %1 by %c1_i32 dim 1 : vector<8x256xf32>, i32 -> vector<8x256xf32>
    %c3 = arith.constant 3 : index
    %c0_20 = arith.constant 0 : index
    %c0_21 = arith.constant 0 : index
    %32 = vector.load %arg2[%c3, %c0_20, %c0_21] : memref<9x1x256xf32, #tpu.memory_space<vmem>>, vector<1x1x256xf32>
    %33 = vector.shape_cast %32 : vector<1x1x256xf32> to vector<1x256xf32>
    %34 = vector.broadcast %33 : vector<1x256xf32> to vector<8x256xf32>
    %35 = arith.mulf %31, %34 : vector<8x256xf32>
    %36 = arith.truncf %35 : vector<8x256xf32> to vector<8x256xbf16>
    %c3_22 = arith.constant 3 : index
    %c0_23 = arith.constant 0 : index
    %c0_24 = arith.constant 0 : index
    %37 = vector.load %arg3[%c3_22, %c0_23, %c0_24] : memref<9x8x8xbf16, #tpu.memory_space<vmem>>, vector<1x8x8xbf16>
    %38 = vector.shape_cast %37 : vector<1x8x8xbf16> to vector<8x8xbf16>
    %cst_25 = arith.constant dense<0.000000e+00> : vector<8x256xf32>
    %39 = tpu.matmul %38, %36, %cst_25 {dimension_numbers = #tpu.dot_dimension_numbers<[1], [0], [0], [1], [0, 0, 1, 1], [], []>} : vector<8x8xbf16>, vector<8x256xbf16>, vector<8x256xf32> -> vector<8x256xf32>
    %40 = arith.addf %30, %39 : vector<8x256xf32>
    %41 = arith.truncf %1 : vector<8x256xf32> to vector<8x256xbf16>
    %c4 = arith.constant 4 : index
    %c0_26 = arith.constant 0 : index
    %c0_27 = arith.constant 0 : index
    %42 = vector.load %arg3[%c4, %c0_26, %c0_27] : memref<9x8x8xbf16, #tpu.memory_space<vmem>>, vector<1x8x8xbf16>
    %43 = vector.shape_cast %42 : vector<1x8x8xbf16> to vector<8x8xbf16>
    %cst_28 = arith.constant dense<0.000000e+00> : vector<8x256xf32>
    %44 = tpu.matmul %43, %41, %cst_28 {dimension_numbers = #tpu.dot_dimension_numbers<[1], [0], [0], [1], [0, 0, 1, 1], [], []>} : vector<8x8xbf16>, vector<8x256xbf16>, vector<8x256xf32> -> vector<8x256xf32>
    %45 = arith.addf %40, %44 : vector<8x256xf32>
    %c255_i32 = arith.constant 255 : i32
    %46 = tpu.dynamic_rotate %1 by %c255_i32 dim 1 : vector<8x256xf32>, i32 -> vector<8x256xf32>
    %c5 = arith.constant 5 : index
    %c0_29 = arith.constant 0 : index
    %c0_30 = arith.constant 0 : index
    %47 = vector.load %arg2[%c5, %c0_29, %c0_30] : memref<9x1x256xf32, #tpu.memory_space<vmem>>, vector<1x1x256xf32>
    %48 = vector.shape_cast %47 : vector<1x1x256xf32> to vector<1x256xf32>
    %49 = vector.broadcast %48 : vector<1x256xf32> to vector<8x256xf32>
    %50 = arith.mulf %46, %49 : vector<8x256xf32>
    %51 = arith.truncf %50 : vector<8x256xf32> to vector<8x256xbf16>
    %c5_31 = arith.constant 5 : index
    %c0_32 = arith.constant 0 : index
    %c0_33 = arith.constant 0 : index
    %52 = vector.load %arg3[%c5_31, %c0_32, %c0_33] : memref<9x8x8xbf16, #tpu.memory_space<vmem>>, vector<1x8x8xbf16>
    %53 = vector.shape_cast %52 : vector<1x8x8xbf16> to vector<8x8xbf16>
    %cst_34 = arith.constant dense<0.000000e+00> : vector<8x256xf32>
    %54 = tpu.matmul %53, %51, %cst_34 {dimension_numbers = #tpu.dot_dimension_numbers<[1], [0], [0], [1], [0, 0, 1, 1], [], []>} : vector<8x8xbf16>, vector<8x256xbf16>, vector<8x256xf32> -> vector<8x256xf32>
    %55 = arith.addf %45, %54 : vector<8x256xf32>
    %c241_i32 = arith.constant 241 : i32
    %56 = tpu.dynamic_rotate %1 by %c241_i32 dim 1 : vector<8x256xf32>, i32 -> vector<8x256xf32>
    %c6 = arith.constant 6 : index
    %c0_35 = arith.constant 0 : index
    %c0_36 = arith.constant 0 : index
    %57 = vector.load %arg2[%c6, %c0_35, %c0_36] : memref<9x1x256xf32, #tpu.memory_space<vmem>>, vector<1x1x256xf32>
    %58 = vector.shape_cast %57 : vector<1x1x256xf32> to vector<1x256xf32>
    %59 = vector.broadcast %58 : vector<1x256xf32> to vector<8x256xf32>
    %60 = arith.mulf %56, %59 : vector<8x256xf32>
    %61 = arith.truncf %60 : vector<8x256xf32> to vector<8x256xbf16>
    %c6_37 = arith.constant 6 : index
    %c0_38 = arith.constant 0 : index
    %c0_39 = arith.constant 0 : index
    %62 = vector.load %arg3[%c6_37, %c0_38, %c0_39] : memref<9x8x8xbf16, #tpu.memory_space<vmem>>, vector<1x8x8xbf16>
    %63 = vector.shape_cast %62 : vector<1x8x8xbf16> to vector<8x8xbf16>
    %cst_40 = arith.constant dense<0.000000e+00> : vector<8x256xf32>
    %64 = tpu.matmul %63, %61, %cst_40 {dimension_numbers = #tpu.dot_dimension_numbers<[1], [0], [0], [1], [0, 0, 1, 1], [], []>} : vector<8x8xbf16>, vector<8x256xbf16>, vector<8x256xf32> -> vector<8x256xf32>
    %65 = arith.addf %55, %64 : vector<8x256xf32>
    %c240_i32 = arith.constant 240 : i32
    %66 = tpu.dynamic_rotate %1 by %c240_i32 dim 1 : vector<8x256xf32>, i32 -> vector<8x256xf32>
    %c7 = arith.constant 7 : index
    %c0_41 = arith.constant 0 : index
    %c0_42 = arith.constant 0 : index
    %67 = vector.load %arg2[%c7, %c0_41, %c0_42] : memref<9x1x256xf32, #tpu.memory_space<vmem>>, vector<1x1x256xf32>
    %68 = vector.shape_cast %67 : vector<1x1x256xf32> to vector<1x256xf32>
    %69 = vector.broadcast %68 : vector<1x256xf32> to vector<8x256xf32>
    %70 = arith.mulf %66, %69 : vector<8x256xf32>
    %71 = arith.truncf %70 : vector<8x256xf32> to vector<8x256xbf16>
    %c7_43 = arith.constant 7 : index
    %c0_44 = arith.constant 0 : index
    %c0_45 = arith.constant 0 : index
    %72 = vector.load %arg3[%c7_43, %c0_44, %c0_45] : memref<9x8x8xbf16, #tpu.memory_space<vmem>>, vector<1x8x8xbf16>
    %73 = vector.shape_cast %72 : vector<1x8x8xbf16> to vector<8x8xbf16>
    %cst_46 = arith.constant dense<0.000000e+00> : vector<8x256xf32>
    %74 = tpu.matmul %73, %71, %cst_46 {dimension_numbers = #tpu.dot_dimension_numbers<[1], [0], [0], [1], [0, 0, 1, 1], [], []>} : vector<8x8xbf16>, vector<8x256xbf16>, vector<8x256xf32> -> vector<8x256xf32>
    %75 = arith.addf %65, %74 : vector<8x256xf32>
    %c239_i32 = arith.constant 239 : i32
    %76 = tpu.dynamic_rotate %1 by %c239_i32 dim 1 : vector<8x256xf32>, i32 -> vector<8x256xf32>
    %c8 = arith.constant 8 : index
    %c0_47 = arith.constant 0 : index
    %c0_48 = arith.constant 0 : index
    %77 = vector.load %arg2[%c8, %c0_47, %c0_48] : memref<9x1x256xf32, #tpu.memory_space<vmem>>, vector<1x1x256xf32>
    %78 = vector.shape_cast %77 : vector<1x1x256xf32> to vector<1x256xf32>
    %79 = vector.broadcast %78 : vector<1x256xf32> to vector<8x256xf32>
    %80 = arith.mulf %76, %79 : vector<8x256xf32>
    %81 = arith.truncf %80 : vector<8x256xf32> to vector<8x256xbf16>
    %c8_49 = arith.constant 8 : index
    %c0_50 = arith.constant 0 : index
    %c0_51 = arith.constant 0 : index
    %82 = vector.load %arg3[%c8_49, %c0_50, %c0_51] : memref<9x8x8xbf16, #tpu.memory_space<vmem>>, vector<1x8x8xbf16>
    %83 = vector.shape_cast %82 : vector<1x8x8xbf16> to vector<8x8xbf16>
    %cst_52 = arith.constant dense<0.000000e+00> : vector<8x256xf32>
    %84 = tpu.matmul %83, %81, %cst_52 {dimension_numbers = #tpu.dot_dimension_numbers<[1], [0], [0], [1], [0, 0, 1, 1], [], []>} : vector<8x8xbf16>, vector<8x256xbf16>, vector<8x256xf32> -> vector<8x256xf32>
    %85 = arith.addf %75, %84 : vector<8x256xf32>
    %c0_53 = arith.constant 0 : index
    %c0_54 = arith.constant 0 : index
    %86 = vector.load %arg4[%c0_53, %c0_54] : memref<8x1xf32, #tpu.memory_space<vmem>>, vector<8x1xf32>
    %87 = vector.broadcast %86 : vector<8x1xf32> to vector<8x256xf32>
    %88 = arith.addf %85, %87 : vector<8x256xf32>
    %cst_55 = arith.constant 0.000000e+00 : f32
    %89 = vector.broadcast %cst_55 : f32 to vector<8x256xf32>
    %90 = arith.maximumf %88, %89 : vector<8x256xf32>
    %c17_i32_56 = arith.constant 17 : i32
    %91 = tpu.dynamic_rotate %90 by %c17_i32_56 dim 1 : vector<8x256xf32>, i32 -> vector<8x256xf32>
    %c0_57 = arith.constant 0 : index
    %c0_58 = arith.constant 0 : index
    %c0_59 = arith.constant 0 : index
    %92 = vector.load %arg2[%c0_57, %c0_58, %c0_59] : memref<9x1x256xf32, #tpu.memory_space<vmem>>, vector<1x1x256xf32>
    %93 = vector.shape_cast %92 : vector<1x1x256xf32> to vector<1x256xf32>
    %94 = vector.broadcast %93 : vector<1x256xf32> to vector<8x256xf32>
    %95 = arith.mulf %91, %94 : vector<8x256xf32>
    %96 = arith.truncf %95 : vector<8x256xf32> to vector<8x256xbf16>
    %c0_60 = arith.constant 0 : index
    %c0_61 = arith.constant 0 : index
    %c0_62 = arith.constant 0 : index
    %97 = vector.load %arg5[%c0_60, %c0_61, %c0_62] : memref<9x8x8xbf16, #tpu.memory_space<vmem>>, vector<1x8x8xbf16>
    %98 = vector.shape_cast %97 : vector<1x8x8xbf16> to vector<8x8xbf16>
    %cst_63 = arith.constant dense<0.000000e+00> : vector<8x256xf32>
    %99 = tpu.matmul %98, %96, %cst_63 {dimension_numbers = #tpu.dot_dimension_numbers<[1], [0], [0], [1], [0, 0, 1, 1], [], []>} : vector<8x8xbf16>, vector<8x256xbf16>, vector<8x256xf32> -> vector<8x256xf32>
    %c16_i32_64 = arith.constant 16 : i32
    %100 = tpu.dynamic_rotate %90 by %c16_i32_64 dim 1 : vector<8x256xf32>, i32 -> vector<8x256xf32>
    %c1_65 = arith.constant 1 : index
    %c0_66 = arith.constant 0 : index
    %c0_67 = arith.constant 0 : index
    %101 = vector.load %arg2[%c1_65, %c0_66, %c0_67] : memref<9x1x256xf32, #tpu.memory_space<vmem>>, vector<1x1x256xf32>
    %102 = vector.shape_cast %101 : vector<1x1x256xf32> to vector<1x256xf32>
    %103 = vector.broadcast %102 : vector<1x256xf32> to vector<8x256xf32>
    %104 = arith.mulf %100, %103 : vector<8x256xf32>
    %105 = arith.truncf %104 : vector<8x256xf32> to vector<8x256xbf16>
    %c1_68 = arith.constant 1 : index
    %c0_69 = arith.constant 0 : index
    %c0_70 = arith.constant 0 : index
    %106 = vector.load %arg5[%c1_68, %c0_69, %c0_70] : memref<9x8x8xbf16, #tpu.memory_space<vmem>>, vector<1x8x8xbf16>
    %107 = vector.shape_cast %106 : vector<1x8x8xbf16> to vector<8x8xbf16>
    %cst_71 = arith.constant dense<0.000000e+00> : vector<8x256xf32>
    %108 = tpu.matmul %107, %105, %cst_71 {dimension_numbers = #tpu.dot_dimension_numbers<[1], [0], [0], [1], [0, 0, 1, 1], [], []>} : vector<8x8xbf16>, vector<8x256xbf16>, vector<8x256xf32> -> vector<8x256xf32>
    %109 = arith.addf %99, %108 : vector<8x256xf32>
    %c15_i32_72 = arith.constant 15 : i32
    %110 = tpu.dynamic_rotate %90 by %c15_i32_72 dim 1 : vector<8x256xf32>, i32 -> vector<8x256xf32>
    %c2_73 = arith.constant 2 : index
    %c0_74 = arith.constant 0 : index
    %c0_75 = arith.constant 0 : index
    %111 = vector.load %arg2[%c2_73, %c0_74, %c0_75] : memref<9x1x256xf32, #tpu.memory_space<vmem>>, vector<1x1x256xf32>
    %112 = vector.shape_cast %111 : vector<1x1x256xf32> to vector<1x256xf32>
    %113 = vector.broadcast %112 : vector<1x256xf32> to vector<8x256xf32>
    %114 = arith.mulf %110, %113 : vector<8x256xf32>
    %115 = arith.truncf %114 : vector<8x256xf32> to vector<8x256xbf16>
    %c2_76 = arith.constant 2 : index
    %c0_77 = arith.constant 0 : index
    %c0_78 = arith.constant 0 : index
    %116 = vector.load %arg5[%c2_76, %c0_77, %c0_78] : memref<9x8x8xbf16, #tpu.memory_space<vmem>>, vector<1x8x8xbf16>
    %117 = vector.shape_cast %116 : vector<1x8x8xbf16> to vector<8x8xbf16>
    %cst_79 = arith.constant dense<0.000000e+00> : vector<8x256xf32>
    %118 = tpu.matmul %117, %115, %cst_79 {dimension_numbers = #tpu.dot_dimension_numbers<[1], [0], [0], [1], [0, 0, 1, 1], [], []>} : vector<8x8xbf16>, vector<8x256xbf16>, vector<8x256xf32> -> vector<8x256xf32>
    %119 = arith.addf %109, %118 : vector<8x256xf32>
    %c1_i32_80 = arith.constant 1 : i32
    %120 = tpu.dynamic_rotate %90 by %c1_i32_80 dim 1 : vector<8x256xf32>, i32 -> vector<8x256xf32>
    %c3_81 = arith.constant 3 : index
    %c0_82 = arith.constant 0 : index
    %c0_83 = arith.constant 0 : index
    %121 = vector.load %arg2[%c3_81, %c0_82, %c0_83] : memref<9x1x256xf32, #tpu.memory_space<vmem>>, vector<1x1x256xf32>
    %122 = vector.shape_cast %121 : vector<1x1x256xf32> to vector<1x256xf32>
    %123 = vector.broadcast %122 : vector<1x256xf32> to vector<8x256xf32>
    %124 = arith.mulf %120, %123 : vector<8x256xf32>
    %125 = arith.truncf %124 : vector<8x256xf32> to vector<8x256xbf16>
    %c3_84 = arith.constant 3 : index
    %c0_85 = arith.constant 0 : index
    %c0_86 = arith.constant 0 : index
    %126 = vector.load %arg5[%c3_84, %c0_85, %c0_86] : memref<9x8x8xbf16, #tpu.memory_space<vmem>>, vector<1x8x8xbf16>
    %127 = vector.shape_cast %126 : vector<1x8x8xbf16> to vector<8x8xbf16>
    %cst_87 = arith.constant dense<0.000000e+00> : vector<8x256xf32>
    %128 = tpu.matmul %127, %125, %cst_87 {dimension_numbers = #tpu.dot_dimension_numbers<[1], [0], [0], [1], [0, 0, 1, 1], [], []>} : vector<8x8xbf16>, vector<8x256xbf16>, vector<8x256xf32> -> vector<8x256xf32>
    %129 = arith.addf %119, %128 : vector<8x256xf32>
    %130 = arith.truncf %90 : vector<8x256xf32> to vector<8x256xbf16>
    %c4_88 = arith.constant 4 : index
    %c0_89 = arith.constant 0 : index
    %c0_90 = arith.constant 0 : index
    %131 = vector.load %arg5[%c4_88, %c0_89, %c0_90] : memref<9x8x8xbf16, #tpu.memory_space<vmem>>, vector<1x8x8xbf16>
    %132 = vector.shape_cast %131 : vector<1x8x8xbf16> to vector<8x8xbf16>
    %cst_91 = arith.constant dense<0.000000e+00> : vector<8x256xf32>
    %133 = tpu.matmul %132, %130, %cst_91 {dimension_numbers = #tpu.dot_dimension_numbers<[1], [0], [0], [1], [0, 0, 1, 1], [], []>} : vector<8x8xbf16>, vector<8x256xbf16>, vector<8x256xf32> -> vector<8x256xf32>
    %134 = arith.addf %129, %133 : vector<8x256xf32>
    %c255_i32_92 = arith.constant 255 : i32
    %135 = tpu.dynamic_rotate %90 by %c255_i32_92 dim 1 : vector<8x256xf32>, i32 -> vector<8x256xf32>
    %c5_93 = arith.constant 5 : index
    %c0_94 = arith.constant 0 : index
    %c0_95 = arith.constant 0 : index
    %136 = vector.load %arg2[%c5_93, %c0_94, %c0_95] : memref<9x1x256xf32, #tpu.memory_space<vmem>>, vector<1x1x256xf32>
    %137 = vector.shape_cast %136 : vector<1x1x256xf32> to vector<1x256xf32>
    %138 = vector.broadcast %137 : vector<1x256xf32> to vector<8x256xf32>
    %139 = arith.mulf %135, %138 : vector<8x256xf32>
    %140 = arith.truncf %139 : vector<8x256xf32> to vector<8x256xbf16>
    %c5_96 = arith.constant 5 : index
    %c0_97 = arith.constant 0 : index
    %c0_98 = arith.constant 0 : index
    %141 = vector.load %arg5[%c5_96, %c0_97, %c0_98] : memref<9x8x8xbf16, #tpu.memory_space<vmem>>, vector<1x8x8xbf16>
    %142 = vector.shape_cast %141 : vector<1x8x8xbf16> to vector<8x8xbf16>
    %cst_99 = arith.constant dense<0.000000e+00> : vector<8x256xf32>
    %143 = tpu.matmul %142, %140, %cst_99 {dimension_numbers = #tpu.dot_dimension_numbers<[1], [0], [0], [1], [0, 0, 1, 1], [], []>} : vector<8x8xbf16>, vector<8x256xbf16>, vector<8x256xf32> -> vector<8x256xf32>
    %144 = arith.addf %134, %143 : vector<8x256xf32>
    %c241_i32_100 = arith.constant 241 : i32
    %145 = tpu.dynamic_rotate %90 by %c241_i32_100 dim 1 : vector<8x256xf32>, i32 -> vector<8x256xf32>
    %c6_101 = arith.constant 6 : index
    %c0_102 = arith.constant 0 : index
    %c0_103 = arith.constant 0 : index
    %146 = vector.load %arg2[%c6_101, %c0_102, %c0_103] : memref<9x1x256xf32, #tpu.memory_space<vmem>>, vector<1x1x256xf32>
    %147 = vector.shape_cast %146 : vector<1x1x256xf32> to vector<1x256xf32>
    %148 = vector.broadcast %147 : vector<1x256xf32> to vector<8x256xf32>
    %149 = arith.mulf %145, %148 : vector<8x256xf32>
    %150 = arith.truncf %149 : vector<8x256xf32> to vector<8x256xbf16>
    %c6_104 = arith.constant 6 : index
    %c0_105 = arith.constant 0 : index
    %c0_106 = arith.constant 0 : index
    %151 = vector.load %arg5[%c6_104, %c0_105, %c0_106] : memref<9x8x8xbf16, #tpu.memory_space<vmem>>, vector<1x8x8xbf16>
    %152 = vector.shape_cast %151 : vector<1x8x8xbf16> to vector<8x8xbf16>
    %cst_107 = arith.constant dense<0.000000e+00> : vector<8x256xf32>
    %153 = tpu.matmul %152, %150, %cst_107 {dimension_numbers = #tpu.dot_dimension_numbers<[1], [0], [0], [1], [0, 0, 1, 1], [], []>} : vector<8x8xbf16>, vector<8x256xbf16>, vector<8x256xf32> -> vector<8x256xf32>
    %154 = arith.addf %144, %153 : vector<8x256xf32>
    %c240_i32_108 = arith.constant 240 : i32
    %155 = tpu.dynamic_rotate %90 by %c240_i32_108 dim 1 : vector<8x256xf32>, i32 -> vector<8x256xf32>
    %c7_109 = arith.constant 7 : index
    %c0_110 = arith.constant 0 : index
    %c0_111 = arith.constant 0 : index
    %156 = vector.load %arg2[%c7_109, %c0_110, %c0_111] : memref<9x1x256xf32, #tpu.memory_space<vmem>>, vector<1x1x256xf32>
    %157 = vector.shape_cast %156 : vector<1x1x256xf32> to vector<1x256xf32>
    %158 = vector.broadcast %157 : vector<1x256xf32> to vector<8x256xf32>
    %159 = arith.mulf %155, %158 : vector<8x256xf32>
    %160 = arith.truncf %159 : vector<8x256xf32> to vector<8x256xbf16>
    %c7_112 = arith.constant 7 : index
    %c0_113 = arith.constant 0 : index
    %c0_114 = arith.constant 0 : index
    %161 = vector.load %arg5[%c7_112, %c0_113, %c0_114] : memref<9x8x8xbf16, #tpu.memory_space<vmem>>, vector<1x8x8xbf16>
    %162 = vector.shape_cast %161 : vector<1x8x8xbf16> to vector<8x8xbf16>
    %cst_115 = arith.constant dense<0.000000e+00> : vector<8x256xf32>
    %163 = tpu.matmul %162, %160, %cst_115 {dimension_numbers = #tpu.dot_dimension_numbers<[1], [0], [0], [1], [0, 0, 1, 1], [], []>} : vector<8x8xbf16>, vector<8x256xbf16>, vector<8x256xf32> -> vector<8x256xf32>
    %164 = arith.addf %154, %163 : vector<8x256xf32>
    %c239_i32_116 = arith.constant 239 : i32
    %165 = tpu.dynamic_rotate %90 by %c239_i32_116 dim 1 : vector<8x256xf32>, i32 -> vector<8x256xf32>
    %c8_117 = arith.constant 8 : index
    %c0_118 = arith.constant 0 : index
    %c0_119 = arith.constant 0 : index
    %166 = vector.load %arg2[%c8_117, %c0_118, %c0_119] : memref<9x1x256xf32, #tpu.memory_space<vmem>>, vector<1x1x256xf32>
    %167 = vector.shape_cast %166 : vector<1x1x256xf32> to vector<1x256xf32>
    %168 = vector.broadcast %167 : vector<1x256xf32> to vector<8x256xf32>
    %169 = arith.mulf %165, %168 : vector<8x256xf32>
    %170 = arith.truncf %169 : vector<8x256xf32> to vector<8x256xbf16>
    %c8_120 = arith.constant 8 : index
    %c0_121 = arith.constant 0 : index
    %c0_122 = arith.constant 0 : index
    %171 = vector.load %arg5[%c8_120, %c0_121, %c0_122] : memref<9x8x8xbf16, #tpu.memory_space<vmem>>, vector<1x8x8xbf16>
    %172 = vector.shape_cast %171 : vector<1x8x8xbf16> to vector<8x8xbf16>
    %cst_123 = arith.constant dense<0.000000e+00> : vector<8x256xf32>
    %173 = tpu.matmul %172, %170, %cst_123 {dimension_numbers = #tpu.dot_dimension_numbers<[1], [0], [0], [1], [0, 0, 1, 1], [], []>} : vector<8x8xbf16>, vector<8x256xbf16>, vector<8x256xf32> -> vector<8x256xf32>
    %174 = arith.addf %164, %173 : vector<8x256xf32>
    %c0_124 = arith.constant 0 : index
    %c0_125 = arith.constant 0 : index
    %175 = vector.load %arg6[%c0_124, %c0_125] : memref<8x1xf32, #tpu.memory_space<vmem>>, vector<8x1xf32>
    %176 = vector.broadcast %175 : vector<8x1xf32> to vector<8x256xf32>
    %177 = arith.addf %174, %176 : vector<8x256xf32>
    %cst_126 = arith.constant 0.000000e+00 : f32
    %178 = vector.broadcast %cst_126 : f32 to vector<8x256xf32>
    %179 = arith.maximumf %177, %178 : vector<8x256xf32>
    %c17_i32_127 = arith.constant 17 : i32
    %180 = tpu.dynamic_rotate %179 by %c17_i32_127 dim 1 : vector<8x256xf32>, i32 -> vector<8x256xf32>
    %c0_128 = arith.constant 0 : index
    %c0_129 = arith.constant 0 : index
    %c0_130 = arith.constant 0 : index
    %181 = vector.load %arg2[%c0_128, %c0_129, %c0_130] : memref<9x1x256xf32, #tpu.memory_space<vmem>>, vector<1x1x256xf32>
    %182 = vector.shape_cast %181 : vector<1x1x256xf32> to vector<1x256xf32>
    %183 = vector.broadcast %182 : vector<1x256xf32> to vector<8x256xf32>
    %184 = arith.mulf %180, %183 : vector<8x256xf32>
    %185 = arith.truncf %184 : vector<8x256xf32> to vector<8x256xbf16>
    %c0_131 = arith.constant 0 : index
    %c0_132 = arith.constant 0 : index
    %c0_133 = arith.constant 0 : index
    %186 = vector.load %arg7[%c0_131, %c0_132, %c0_133] : memref<9x8x8xbf16, #tpu.memory_space<vmem>>, vector<1x8x8xbf16>
    %187 = vector.shape_cast %186 : vector<1x8x8xbf16> to vector<8x8xbf16>
    %cst_134 = arith.constant dense<0.000000e+00> : vector<8x256xf32>
    %188 = tpu.matmul %187, %185, %cst_134 {dimension_numbers = #tpu.dot_dimension_numbers<[1], [0], [0], [1], [0, 0, 1, 1], [], []>} : vector<8x8xbf16>, vector<8x256xbf16>, vector<8x256xf32> -> vector<8x256xf32>
    %c16_i32_135 = arith.constant 16 : i32
    %189 = tpu.dynamic_rotate %179 by %c16_i32_135 dim 1 : vector<8x256xf32>, i32 -> vector<8x256xf32>
    %c1_136 = arith.constant 1 : index
    %c0_137 = arith.constant 0 : index
    %c0_138 = arith.constant 0 : index
    %190 = vector.load %arg2[%c1_136, %c0_137, %c0_138] : memref<9x1x256xf32, #tpu.memory_space<vmem>>, vector<1x1x256xf32>
    %191 = vector.shape_cast %190 : vector<1x1x256xf32> to vector<1x256xf32>
    %192 = vector.broadcast %191 : vector<1x256xf32> to vector<8x256xf32>
    %193 = arith.mulf %189, %192 : vector<8x256xf32>
    %194 = arith.truncf %193 : vector<8x256xf32> to vector<8x256xbf16>
    %c1_139 = arith.constant 1 : index
    %c0_140 = arith.constant 0 : index
    %c0_141 = arith.constant 0 : index
    %195 = vector.load %arg7[%c1_139, %c0_140, %c0_141] : memref<9x8x8xbf16, #tpu.memory_space<vmem>>, vector<1x8x8xbf16>
    %196 = vector.shape_cast %195 : vector<1x8x8xbf16> to vector<8x8xbf16>
    %cst_142 = arith.constant dense<0.000000e+00> : vector<8x256xf32>
    %197 = tpu.matmul %196, %194, %cst_142 {dimension_numbers = #tpu.dot_dimension_numbers<[1], [0], [0], [1], [0, 0, 1, 1], [], []>} : vector<8x8xbf16>, vector<8x256xbf16>, vector<8x256xf32> -> vector<8x256xf32>
    %198 = arith.addf %188, %197 : vector<8x256xf32>
    %c15_i32_143 = arith.constant 15 : i32
    %199 = tpu.dynamic_rotate %179 by %c15_i32_143 dim 1 : vector<8x256xf32>, i32 -> vector<8x256xf32>
    %c2_144 = arith.constant 2 : index
    %c0_145 = arith.constant 0 : index
    %c0_146 = arith.constant 0 : index
    %200 = vector.load %arg2[%c2_144, %c0_145, %c0_146] : memref<9x1x256xf32, #tpu.memory_space<vmem>>, vector<1x1x256xf32>
    %201 = vector.shape_cast %200 : vector<1x1x256xf32> to vector<1x256xf32>
    %202 = vector.broadcast %201 : vector<1x256xf32> to vector<8x256xf32>
    %203 = arith.mulf %199, %202 : vector<8x256xf32>
    %204 = arith.truncf %203 : vector<8x256xf32> to vector<8x256xbf16>
    %c2_147 = arith.constant 2 : index
    %c0_148 = arith.constant 0 : index
    %c0_149 = arith.constant 0 : index
    %205 = vector.load %arg7[%c2_147, %c0_148, %c0_149] : memref<9x8x8xbf16, #tpu.memory_space<vmem>>, vector<1x8x8xbf16>
    %206 = vector.shape_cast %205 : vector<1x8x8xbf16> to vector<8x8xbf16>
    %cst_150 = arith.constant dense<0.000000e+00> : vector<8x256xf32>
    %207 = tpu.matmul %206, %204, %cst_150 {dimension_numbers = #tpu.dot_dimension_numbers<[1], [0], [0], [1], [0, 0, 1, 1], [], []>} : vector<8x8xbf16>, vector<8x256xbf16>, vector<8x256xf32> -> vector<8x256xf32>
    %208 = arith.addf %198, %207 : vector<8x256xf32>
    %c1_i32_151 = arith.constant 1 : i32
    %209 = tpu.dynamic_rotate %179 by %c1_i32_151 dim 1 : vector<8x256xf32>, i32 -> vector<8x256xf32>
    %c3_152 = arith.constant 3 : index
    %c0_153 = arith.constant 0 : index
    %c0_154 = arith.constant 0 : index
    %210 = vector.load %arg2[%c3_152, %c0_153, %c0_154] : memref<9x1x256xf32, #tpu.memory_space<vmem>>, vector<1x1x256xf32>
    %211 = vector.shape_cast %210 : vector<1x1x256xf32> to vector<1x256xf32>
    %212 = vector.broadcast %211 : vector<1x256xf32> to vector<8x256xf32>
    %213 = arith.mulf %209, %212 : vector<8x256xf32>
    %214 = arith.truncf %213 : vector<8x256xf32> to vector<8x256xbf16>
    %c3_155 = arith.constant 3 : index
    %c0_156 = arith.constant 0 : index
    %c0_157 = arith.constant 0 : index
    %215 = vector.load %arg7[%c3_155, %c0_156, %c0_157] : memref<9x8x8xbf16, #tpu.memory_space<vmem>>, vector<1x8x8xbf16>
    %216 = vector.shape_cast %215 : vector<1x8x8xbf16> to vector<8x8xbf16>
    %cst_158 = arith.constant dense<0.000000e+00> : vector<8x256xf32>
    %217 = tpu.matmul %216, %214, %cst_158 {dimension_numbers = #tpu.dot_dimension_numbers<[1], [0], [0], [1], [0, 0, 1, 1], [], []>} : vector<8x8xbf16>, vector<8x256xbf16>, vector<8x256xf32> -> vector<8x256xf32>
    %218 = arith.addf %208, %217 : vector<8x256xf32>
    %219 = arith.truncf %179 : vector<8x256xf32> to vector<8x256xbf16>
    %c4_159 = arith.constant 4 : index
    %c0_160 = arith.constant 0 : index
    %c0_161 = arith.constant 0 : index
    %220 = vector.load %arg7[%c4_159, %c0_160, %c0_161] : memref<9x8x8xbf16, #tpu.memory_space<vmem>>, vector<1x8x8xbf16>
    %221 = vector.shape_cast %220 : vector<1x8x8xbf16> to vector<8x8xbf16>
    %cst_162 = arith.constant dense<0.000000e+00> : vector<8x256xf32>
    %222 = tpu.matmul %221, %219, %cst_162 {dimension_numbers = #tpu.dot_dimension_numbers<[1], [0], [0], [1], [0, 0, 1, 1], [], []>} : vector<8x8xbf16>, vector<8x256xbf16>, vector<8x256xf32> -> vector<8x256xf32>
    %223 = arith.addf %218, %222 : vector<8x256xf32>
    %c255_i32_163 = arith.constant 255 : i32
    %224 = tpu.dynamic_rotate %179 by %c255_i32_163 dim 1 : vector<8x256xf32>, i32 -> vector<8x256xf32>
    %c5_164 = arith.constant 5 : index
    %c0_165 = arith.constant 0 : index
    %c0_166 = arith.constant 0 : index
    %225 = vector.load %arg2[%c5_164, %c0_165, %c0_166] : memref<9x1x256xf32, #tpu.memory_space<vmem>>, vector<1x1x256xf32>
    %226 = vector.shape_cast %225 : vector<1x1x256xf32> to vector<1x256xf32>
    %227 = vector.broadcast %226 : vector<1x256xf32> to vector<8x256xf32>
    %228 = arith.mulf %224, %227 : vector<8x256xf32>
    %229 = arith.truncf %228 : vector<8x256xf32> to vector<8x256xbf16>
    %c5_167 = arith.constant 5 : index
    %c0_168 = arith.constant 0 : index
    %c0_169 = arith.constant 0 : index
    %230 = vector.load %arg7[%c5_167, %c0_168, %c0_169] : memref<9x8x8xbf16, #tpu.memory_space<vmem>>, vector<1x8x8xbf16>
    %231 = vector.shape_cast %230 : vector<1x8x8xbf16> to vector<8x8xbf16>
    %cst_170 = arith.constant dense<0.000000e+00> : vector<8x256xf32>
    %232 = tpu.matmul %231, %229, %cst_170 {dimension_numbers = #tpu.dot_dimension_numbers<[1], [0], [0], [1], [0, 0, 1, 1], [], []>} : vector<8x8xbf16>, vector<8x256xbf16>, vector<8x256xf32> -> vector<8x256xf32>
    %233 = arith.addf %223, %232 : vector<8x256xf32>
    %c241_i32_171 = arith.constant 241 : i32
    %234 = tpu.dynamic_rotate %179 by %c241_i32_171 dim 1 : vector<8x256xf32>, i32 -> vector<8x256xf32>
    %c6_172 = arith.constant 6 : index
    %c0_173 = arith.constant 0 : index
    %c0_174 = arith.constant 0 : index
    %235 = vector.load %arg2[%c6_172, %c0_173, %c0_174] : memref<9x1x256xf32, #tpu.memory_space<vmem>>, vector<1x1x256xf32>
    %236 = vector.shape_cast %235 : vector<1x1x256xf32> to vector<1x256xf32>
    %237 = vector.broadcast %236 : vector<1x256xf32> to vector<8x256xf32>
    %238 = arith.mulf %234, %237 : vector<8x256xf32>
    %239 = arith.truncf %238 : vector<8x256xf32> to vector<8x256xbf16>
    %c6_175 = arith.constant 6 : index
    %c0_176 = arith.constant 0 : index
    %c0_177 = arith.constant 0 : index
    %240 = vector.load %arg7[%c6_175, %c0_176, %c0_177] : memref<9x8x8xbf16, #tpu.memory_space<vmem>>, vector<1x8x8xbf16>
    %241 = vector.shape_cast %240 : vector<1x8x8xbf16> to vector<8x8xbf16>
    %cst_178 = arith.constant dense<0.000000e+00> : vector<8x256xf32>
    %242 = tpu.matmul %241, %239, %cst_178 {dimension_numbers = #tpu.dot_dimension_numbers<[1], [0], [0], [1], [0, 0, 1, 1], [], []>} : vector<8x8xbf16>, vector<8x256xbf16>, vector<8x256xf32> -> vector<8x256xf32>
    %243 = arith.addf %233, %242 : vector<8x256xf32>
    %c240_i32_179 = arith.constant 240 : i32
    %244 = tpu.dynamic_rotate %179 by %c240_i32_179 dim 1 : vector<8x256xf32>, i32 -> vector<8x256xf32>
    %c7_180 = arith.constant 7 : index
    %c0_181 = arith.constant 0 : index
    %c0_182 = arith.constant 0 : index
    %245 = vector.load %arg2[%c7_180, %c0_181, %c0_182] : memref<9x1x256xf32, #tpu.memory_space<vmem>>, vector<1x1x256xf32>
    %246 = vector.shape_cast %245 : vector<1x1x256xf32> to vector<1x256xf32>
    %247 = vector.broadcast %246 : vector<1x256xf32> to vector<8x256xf32>
    %248 = arith.mulf %244, %247 : vector<8x256xf32>
    %249 = arith.truncf %248 : vector<8x256xf32> to vector<8x256xbf16>
    %c7_183 = arith.constant 7 : index
    %c0_184 = arith.constant 0 : index
    %c0_185 = arith.constant 0 : index
    %250 = vector.load %arg7[%c7_183, %c0_184, %c0_185] : memref<9x8x8xbf16, #tpu.memory_space<vmem>>, vector<1x8x8xbf16>
    %251 = vector.shape_cast %250 : vector<1x8x8xbf16> to vector<8x8xbf16>
    %cst_186 = arith.constant dense<0.000000e+00> : vector<8x256xf32>
    %252 = tpu.matmul %251, %249, %cst_186 {dimension_numbers = #tpu.dot_dimension_numbers<[1], [0], [0], [1], [0, 0, 1, 1], [], []>} : vector<8x8xbf16>, vector<8x256xbf16>, vector<8x256xf32> -> vector<8x256xf32>
    %253 = arith.addf %243, %252 : vector<8x256xf32>
    %c239_i32_187 = arith.constant 239 : i32
    %254 = tpu.dynamic_rotate %179 by %c239_i32_187 dim 1 : vector<8x256xf32>, i32 -> vector<8x256xf32>
    %c8_188 = arith.constant 8 : index
    %c0_189 = arith.constant 0 : index
    %c0_190 = arith.constant 0 : index
    %255 = vector.load %arg2[%c8_188, %c0_189, %c0_190] : memref<9x1x256xf32, #tpu.memory_space<vmem>>, vector<1x1x256xf32>
    %256 = vector.shape_cast %255 : vector<1x1x256xf32> to vector<1x256xf32>
    %257 = vector.broadcast %256 : vector<1x256xf32> to vector<8x256xf32>
    %258 = arith.mulf %254, %257 : vector<8x256xf32>
    %259 = arith.truncf %258 : vector<8x256xf32> to vector<8x256xbf16>
    %c8_191 = arith.constant 8 : index
    %c0_192 = arith.constant 0 : index
    %c0_193 = arith.constant 0 : index
    %260 = vector.load %arg7[%c8_191, %c0_192, %c0_193] : memref<9x8x8xbf16, #tpu.memory_space<vmem>>, vector<1x8x8xbf16>
    %261 = vector.shape_cast %260 : vector<1x8x8xbf16> to vector<8x8xbf16>
    %cst_194 = arith.constant dense<0.000000e+00> : vector<8x256xf32>
    %262 = tpu.matmul %261, %259, %cst_194 {dimension_numbers = #tpu.dot_dimension_numbers<[1], [0], [0], [1], [0, 0, 1, 1], [], []>} : vector<8x8xbf16>, vector<8x256xbf16>, vector<8x256xf32> -> vector<8x256xf32>
    %263 = arith.addf %253, %262 : vector<8x256xf32>
    %c0_195 = arith.constant 0 : index
    %c0_196 = arith.constant 0 : index
    %264 = vector.load %arg8[%c0_195, %c0_196] : memref<8x1xf32, #tpu.memory_space<vmem>>, vector<8x1xf32>
    %265 = vector.broadcast %264 : vector<8x1xf32> to vector<8x256xf32>
    %266 = arith.addf %263, %265 : vector<8x256xf32>
    %267 = arith.addf %266, %90 : vector<8x256xf32>
    %cst_197 = arith.constant 0.000000e+00 : f32
    %268 = vector.broadcast %cst_197 : f32 to vector<8x256xf32>
    %269 = arith.maximumf %267, %268 : vector<8x256xf32>
    %cst_198 = arith.constant dense<0.000000e+00> : vector<8xf32>
    %270 = vector.multi_reduction <add>, %269, %cst_198 [1] : vector<8x256xf32> to vector<8xf32>
    %271 = vector.shape_cast %270 : vector<8xf32> to vector<8x1xf32>
    %cst_199 = arith.constant 2.560000e+02 : f32
    %272 = vector.broadcast %cst_199 : f32 to vector<8x1xf32>
    %273 = arith.divf %271, %272 : vector<8x1xf32>
    %c0_200 = arith.constant 0 : index
    %c0_201 = arith.constant 0 : index
    %274 = vector.load %arg9[%c0_200, %c0_201] : memref<8x32xf32, #tpu.memory_space<vmem>>, vector<8x32xf32>
    %275 = vector.broadcast %273 : vector<8x1xf32> to vector<8x32xf32>
    %276 = arith.mulf %274, %275 : vector<8x32xf32>
    %cst_202 = arith.constant dense<0.000000e+00> : vector<32xf32>
    %277 = vector.multi_reduction <add>, %276, %cst_202 [0] : vector<8x32xf32> to vector<32xf32>
    %278 = vector.shape_cast %277 : vector<32xf32> to vector<1x32xf32>
    %c0_203 = arith.constant 0 : index
    %c0_204 = arith.constant 0 : index
    %279 = vector.load %arg10[%c0_203, %c0_204] : memref<1x32xf32, #tpu.memory_space<vmem>>, vector<1x32xf32>
    %280 = arith.addf %278, %279 : vector<1x32xf32>
    %cst_205 = arith.constant 0.000000e+00 : f32
    %281 = vector.broadcast %cst_205 : f32 to vector<1x32xf32>
    %282 = arith.maximumf %280, %281 : vector<1x32xf32>
    %c0_206 = arith.constant 0 : index
    %c0_207 = arith.constant 0 : index
    %283 = vector.load %arg11[%c0_206, %c0_207] : memref<32x10xf32, #tpu.memory_space<vmem>>, vector<32x10xf32>
    %cst_208 = arith.constant dense<0.000000e+00> : vector<1x10xf32>
    %284 = tpu.matmul %282, %283, %cst_208 {dimension_numbers = #tpu.dot_dimension_numbers<[1], [0], [0], [1], [0, 0, 1, 1], [], []>} : vector<1x32xf32>, vector<32x10xf32>, vector<1x10xf32> -> vector<1x10xf32>
    %c0_209 = arith.constant 0 : index
    %c0_210 = arith.constant 0 : index
    %285 = vector.load %arg12[%c0_209, %c0_210] : memref<1x10xf32, #tpu.memory_space<vmem>>, vector<1x10xf32>
    %286 = arith.addf %284, %285 : vector<1x10xf32>
    %c0_211 = arith.constant 0 : index
    %c0_212 = arith.constant 0 : index
    %c0_213 = arith.constant 0 : index
    %287 = vector.load %arg13[%c0_211, %c0_212, %c0_213] : memref<1x1x10xf32, #tpu.memory_space<vmem>>, vector<1x1x10xf32>
    %288 = vector.shape_cast %287 : vector<1x1x10xf32> to vector<1x10xf32>
    %289 = vector.shape_cast %286 : vector<1x10xf32> to vector<1x1x10xf32>
    tpu.vector_store %arg13[%c0_211, %c0_212, %c0_213], %289 {strides = array<i32>} : memref<1x1x10xf32, #tpu.memory_space<vmem>>, vector<1x1x10xf32>,
    return
  }
  func.func @transform_0(%arg0: i32) -> (i32, i32, i32) {
    %c0_i32 = arith.constant 0 : i32
    %c0_i32_0 = arith.constant 0 : i32
    %c0_i32_1 = arith.constant 0 : i32
    return %arg0, %c0_i32, %c0_i32_0 : i32, i32, i32
  }
  func.func @transform_1(%arg0: i32) -> (i32, i32, i32) {
    %c0_i32 = arith.constant 0 : i32
    %c0_i32_0 = arith.constant 0 : i32
    %c0_i32_1 = arith.constant 0 : i32
    %c0_i32_2 = arith.constant 0 : i32
    return %c0_i32, %c0_i32_0, %c0_i32_1 : i32, i32, i32
  }
  func.func @transform_2(%arg0: i32) -> (i32, i32, i32) {
    %c0_i32 = arith.constant 0 : i32
    %c0_i32_0 = arith.constant 0 : i32
    %c0_i32_1 = arith.constant 0 : i32
    %c0_i32_2 = arith.constant 0 : i32
    return %c0_i32, %c0_i32_0, %c0_i32_1 : i32, i32, i32
  }
  func.func @transform_3(%arg0: i32) -> (i32, i32) {
    %c0_i32 = arith.constant 0 : i32
    %c0_i32_0 = arith.constant 0 : i32
    %c0_i32_1 = arith.constant 0 : i32
    return %c0_i32, %c0_i32_0 : i32, i32
  }
  func.func @transform_4(%arg0: i32) -> (i32, i32, i32) {
    %c0_i32 = arith.constant 0 : i32
    %c0_i32_0 = arith.constant 0 : i32
    %c0_i32_1 = arith.constant 0 : i32
    %c0_i32_2 = arith.constant 0 : i32
    return %c0_i32, %c0_i32_0, %c0_i32_1 : i32, i32, i32
  }
  func.func @transform_5(%arg0: i32) -> (i32, i32) {
    %c0_i32 = arith.constant 0 : i32
    %c0_i32_0 = arith.constant 0 : i32
    %c0_i32_1 = arith.constant 0 : i32
    return %c0_i32, %c0_i32_0 : i32, i32
  }
  func.func @transform_6(%arg0: i32) -> (i32, i32, i32) {
    %c0_i32 = arith.constant 0 : i32
    %c0_i32_0 = arith.constant 0 : i32
    %c0_i32_1 = arith.constant 0 : i32
    %c0_i32_2 = arith.constant 0 : i32
    return %c0_i32, %c0_i32_0, %c0_i32_1 : i32, i32, i32
  }
  func.func @transform_7(%arg0: i32) -> (i32, i32) {
    %c0_i32 = arith.constant 0 : i32
    %c0_i32_0 = arith.constant 0 : i32
    %c0_i32_1 = arith.constant 0 : i32
    return %c0_i32, %c0_i32_0 : i32, i32
  }
  func.func @transform_8(%arg0: i32) -> (i32, i32) {
    %c0_i32 = arith.constant 0 : i32
    %c0_i32_0 = arith.constant 0 : i32
    %c0_i32_1 = arith.constant 0 : i32
    return %c0_i32, %c0_i32_0 : i32, i32
  }
  func.func @transform_9(%arg0: i32) -> (i32, i32) {
    %c0_i32 = arith.constant 0 : i32
    %c0_i32_0 = arith.constant 0 : i32
    %c0_i32_1 = arith.constant 0 : i32
    return %c0_i32, %c0_i32_0 : i32, i32
  }
  func.func @transform_10(%arg0: i32) -> (i32, i32) {
    %c0_i32 = arith.constant 0 : i32
    %c0_i32_0 = arith.constant 0 : i32
    %c0_i32_1 = arith.constant 0 : i32
    return %c0_i32, %c0_i32_0 : i32, i32
  }
  func.func @transform_11(%arg0: i32) -> (i32, i32) {
    %c0_i32 = arith.constant 0 : i32
    %c0_i32_0 = arith.constant 0 : i32
    %c0_i32_1 = arith.constant 0 : i32
    return %c0_i32, %c0_i32_0 : i32, i32
  }
  func.func @transform_12(%arg0: i32) -> (i32, i32, i32) {
    %c0_i32 = arith.constant 0 : i32
    %c0_i32_0 = arith.constant 0 : i32
    %c0_i32_1 = arith.constant 0 : i32
    return %arg0, %c0_i32, %c0_i32_0 : i32, i32, i32
  }
}

</mosaic_0001>

<bundles_post_ra>
// kernel: resnet_mlp_forward.1
= control target key start
LH: loop header
LB: loop body
LE: loop exit
PB: predicated region body
PF: predicated region fallthrough
CT: control target
= control target key end

     0   :  { %s2842_s0 = inlined_call_operand.vmem [shape: f32[2,8,256], index: 0, kind: input, shape index: {}]   ;;  %s2843_s1 = inlined_call_operand.vmem [shape: f32[9,1,256], index: 1, kind: input, shape index: {}]   ;;  %s2844_s2 = inlined_call_operand.vmem [shape: bf16[9,8,8], index: 2, kind: input, shape index: {}]   ;;  %s2845_s3 = inlined_call_operand.vmem [shape: f32[8,1], index: 3, kind: input, shape index: {}]   ;;  %s2846_s4 = inlined_call_operand.vmem [shape: bf16[9,8,8], index: 4, kind: input, shape index: {}]   ;;  %s2847_s5 = inlined_call_operand.vmem [shape: f32[8,1], index: 5, kind: input, shape index: {}]   ;;  %s2848_s6 = inlined_call_operand.vmem [shape: bf16[9,8,8], index: 6, kind: input, shape index: {}]   ;;  %s2849_s7 = inlined_call_operand.vmem [shape: f32[8,1], index: 7, kind: input, shape index: {}]   ;;  %s2850_s8 = inlined_call_operand.vmem [shape: f32[8,32], index: 8, kind: input, shape index: {}]   ;;  %s2851_s9 = inlined_call_operand.vmem [shape: f32[1,32], index: 9, kind: input, shape index: {}]   ;;  %s2852_s10 = inlined_call_operand.vmem [shape: f32[32,10], index: 10, kind: input, shape index: {}]   ;;  %s2853_s11 = inlined_call_operand.vmem [shape: f32[1,10], index: 11, kind: input, shape index: {}]   ;;  %s2854_s12 = inlined_call_operand.hbm [shape: f32[2,1,10], index: 12, kind: output, shape index: {}]  }
   0x1   :  { %2871 = sst [smem:[#allocation5_spill]] %s2842_s0 }
   0x2   :  { %2872 = sst [smem:[#allocation6_spill]] %s2843_s1 }
   0x3   :  { %2873 = sst [smem:[#allocation7_spill]] %s2844_s2 }
   0x4   :  { %17 = vsyncpa [#allocation3], 0 }
   0x5   :  { %19 = vsyncpa [#allocation3 + $0x1], 0  ;;  %s2206_s21 = smov 0   ;;  %s2208_s22 = smov 0  }
   0x6   :  { %s2210_s23 = smov 0   ;;  %s2212_s24 = smov 0  }
   0x7 LB: > { %s2227_s25 = sadd.s32 4294967295, %s2129_s24   ;;  %s1919_s26 = sadd.s32 4294967294, %s2129_s24   ;;  %s2129_s24 = sphi %s2212_s24, %s2890_s24   ;;  %s2125_s23 = sphi %s2210_s23, %s2889_s23   ;;  %s2121_s22 = sphi %s2208_s22, %s2888_s22   ;;  %s2117_s21 = sphi %s2206_s21, %s2887_s21  }
   0x8   : > { %s2231_s27 = sadd.s32 1, %s2129_s24   ;;  %s289_s28 = sadd.s32 1, %s2125_s23 }
   0x9   : > { %s286_s29 = ssub.s32 %s2129_s24, %s2231_s27  ;;  %p299_p0 = scmp.ne.s32.totalorder %s2125_s23, %s2121_s22 }
   0xa   : > { %p287_p1 = scmp.eq.s32.totalorder %s286_s29, 0  ;;  %p300_p2 = scmp.eq.s32.totalorder %s2227_s25, 1 }
   0xb   : > { %p305_p3 = scmp.ne.s32.totalorder %s2121_s22, %s2117_s21  ;;  %p306_p4 = scmp.eq.s32.totalorder %s1919_s26, 1 }
   0xc   : > { %s2242_s30 = scalar_select %p287_p1, %s2125_s23, %s289_s28  }
   0xd   : > { %p2244_p5 = por %p300_p2, %p299_p0  ;;  %p2248_p6 = por %p306_p4, %p305_p3 }
   0xe   : > { %p1922_p7 = scmp.ge.s32.totalorder %s2129_s24, 1  ;;  %p365_p8 = scmp.lt.s32.totalorder %s2129_s24, 3 }
  0x10   : > { %p366_p9 = pnand %p1922_p7, %p365_p8 }
  0x11   : > { %p406_p10 = scmp.lt.s32.totalorder (!%p366_p9), %s2227_s25, 1  ;;  %s2876_s0 = sld [smem:[#allocation5_spill]] (!%p366_p9) }
  0x12   : > { %369 = sbr.rel (%p366_p9) target bundleno = 1282 (0x502), region = 68  ;;  %s2865_s20 = smov (!%p366_p9), 17  }
  0x13   : > { %s2869_s26 = smov (!%p366_p9), 16   ;;  %s2867_s28 = smov (!%p366_p9), 15  }
  0x14   : > { %s2863_s29 = smov (!%p366_p9), 1   ;;  %s2857_s17 = smov (!%p366_p9), 112  }
  0x15   : > { %s2859_s18 = smov (!%p366_p9), 111   ;;  %s2877_s1 = sld [smem:[#allocation6_spill]] (!%p366_p9) }
  0x16   : > { %s2878_s2 = sld [smem:[#allocation7_spill]] (!%p366_p9) }
  0x17   : > { %s407_s15 = scalar_select %p406_p10, %s2227_s25, 1  ;;  %v418_v3 = vlaneseq  ;;  %vm458_vm3 = vcmask 1043456   ;;  %vm454_vm5 = vcmask 64512   ;;  %vm1810_vm11 = vcmask 261120  }
  0x18   : > { %vm1849_vm12 = vcmask 73728  }
  0x19   : > { %s2013_s16 = sshll.u32 %s407_s15, 4  ;;  %s2855_s15 = smov 127   ;;  %v2295_v4 = vand.u32 127, %v418_v3 }
  0x1a   : > { %s410_s19 = scalar_lea.vmem %s2876_s0, %s2013_s16  ;;  %s2861_s16 = smov 113  }
  0x1b   : > { %v2259_v0 = vld [vmem:[%s410_s19] sm:$0xff]  ;;  %v2267_v1 = vld [vmem:[%s410_s19 + $0x8] sm:$0xff]  ;;  %vm530_vm0 = vcmp.lt.s32.totalorder %v2295_v4, 15  ;;  %vm420_vm1 = vcmp.lt.s32.totalorder %v2295_v4, 17  ;;  %vm438_vm2 = vcmp.lt.s32.totalorder %v2295_v4, 16  ;;  %vm587_vm4 = vcmp.lt.s32.totalorder %v2295_v4, 1 }
  0x1c   : > { %414 = vrot.lane.b32.xlu1 %v2259_v0, %s2865_s20  ;;  %434 = vrot.lane.b32.xlu0 %v2259_v0, %s2869_s26  ;;  %v1931_v5 = vld [vmem:[%s2877_s1 + $0x4] sm:$0x3]  ;;  %v1925_v13 = vld [vmem:[%s2877_s1 + $0x2] sm:$0x3]  ;;  %v640_v42 = vpack.c.bf16 %v2259_v0, %v2259_v0  ;;  %v641_v43 = vpack.c.bf16 %v2267_v1, %v2267_v1  ;;  %vm685_vm6 = vcmp.lt.s32.totalorder %v2295_v4, 127  ;;  %vm742_vm7 = vcmp.lt.s32.totalorder %v2295_v4, 113 }
  0x1d   : > { %526 = vrot.lane.b32.xlu2 %v2259_v0, %s2867_s28  ;;  %v2301_v9 = vperm.slane %v1931_v5, 0  ;;  %v2303_v10 = vperm.slane %v1931_v5, 1  ;;  %v423_v14 = vld [vmem:[%s2877_s1] sm:$0x3]  ;;  %v2319_v17 = vperm.slane %v1925_v13, 0  ;;  %v2321_v18 = vperm.slane %v1925_v13, 1 }
  0x1e   : > { %v2323_v19 = vperm.slane %v423_v14, 0  ;;  %v2325_v20 = vperm.slane %v423_v14, 1  ;;  %v1935_v25 = vld [vmem:[%s2877_s1 + $0x6] sm:$0x3]  ;;  %v433_v50 = vld [vmem:[%s2878_s2] sm:$0xf] }
  0x1f   : > { %v2343_v34 = vperm.slane %v1935_v25, 0  ;;  %v2345_v35 = vperm.slane %v1935_v25, 1  ;;  %v1926_v49 = vld [vmem:[%s2878_s2 + $0x4] sm:$0xf]  ;;  %v648_v55 = vsel %vm458_vm3, %v640_v42, 0  ;;  %v651_v56 = vsel %vm458_vm3, %v641_v43, 0 }
  0x20   : > { %v1942_v59 = vld [vmem:[%s2877_s1 + $0xa] sm:$0x3]  ;;  %v1946_v60 = vld [vmem:[%s2877_s1 + $0xc] sm:$0x3]  ;;  %vm799_vm8 = vcmp.lt.s32.totalorder %v2295_v4, 112  ;;  %vm856_vm9 = vcmp.lt.s32.totalorder %v2295_v4, 111 }
  0x21   : > { %v2382_v63 = vperm.slane %v1942_v59, 0  ;;  %v2389_v3 = vperm.slane %v1946_v60, 0  ;;  %v2391_v5 = vperm.slane %v1946_v60, 1  ;;  %v1943_v60 = vld [vmem:[%s2878_s2 + $0x14] sm:$0xf]  ;;  %s2880_s19 = smov 113  }
  0x22   : > { %v1998_v4 = vld [vmem:[%s2848_s6 + $0x14] sm:$0xf]  ;;  %s2087_s0 = scalar_lea.hbm %s2854_s12, 2 }
  0x24   : > { %416 = vrot.lane.b32.xlu1 %v2267_v1, %s2865_s20  ;;  %436 = vrot.lane.b32.xlu0 %v2267_v1, %s2869_s26 }
  0x25   : > { %528 = vrot.lane.b32.xlu2 %v2267_v1, %s2867_s28 }
  0x2c   : > { %585 = vrot.lane.b32.xlu1 %v2267_v1, %s2863_s29  ;;  %583 = vrot.lane.b32.xlu0 %v2259_v0, %s2863_s29  ;;  %s2883_s29 = smov 112  }
  0x2d   : > { %681 = vrot.lane.b32.xlu2 %v2259_v0, %s2855_s15 }
  0x34   : > { %683 = vrot.lane.b32.xlu0 %v2267_v1, %s2855_s15  ;;  %738 = vrot.lane.b32.xlu1 %v2259_v0, %s2861_s16  ;;  %s2879_s15 = smov 1  }
  0x35   : > { %740 = vrot.lane.b32.xlu2 %v2267_v1, %s2861_s16  ;;  %s2885_s16 = smov 15  }
  0x3c   : > { %797 = vrot.lane.b32.xlu1 %v2267_v1, %s2857_s17  ;;  %795 = vrot.lane.b32.xlu0 %v2259_v0, %s2857_s17  ;;  %s2881_s17 = smov 127  }
  0x3d   : > { %852 = vrot.lane.b32.xlu2 %v2259_v0, %s2859_s18  ;;  %v2384_v0 = vperm.slane %v1942_v59, 1  ;;  %v1939_v59 = vld [vmem:[%s2878_s2 + $0x10] sm:$0xf] }
  0x44   : > { %854 = vrot.lane.b32.xlu0 %v2267_v1, %s2859_s18  ;;  %s2882_s18 = smov 111  }
  0x77   : > { %v527_v2 = vpop.permute.xlu2 %526 }
  0x7f   : > { %v529_v6 = vpop.permute.xlu2 %528 }
  0x80   : > { %v531_v11 = vsel %vm530_vm0, %v527_v2, %v529_v6  ;;  %v532_v12 = vsel %vm530_vm0, %v529_v6, %v527_v2 }
  0x81   : > { %v540_v15 = vmul.f32 %v2301_v9, %v532_v12  ;;  %v541_v16 = vmul.f32 %v2303_v10, %v531_v11 }
  0x83   : > { %v542_v23 = vpack.c.bf16 %v540_v15, %v540_v15  ;;  %v543_v24 = vpack.c.bf16 %v541_v16, %v541_v16 }
  0x85   : > { %v550_v40 = vsel %vm458_vm3, %v542_v23, 0  ;;  %v553_v41 = vsel %vm458_vm3, %v543_v24, 0  ;;  %v1950_v23 = vld [vmem:[%s2877_s1 + $0xe] sm:$0x3] }
  0x87   : > { %v682_v48 = vpop.permute.xlu2 %681 }
  0x8e   : > { %v415_v7 = vpop.permute.xlu1 %414  ;;  %v435_v8 = vpop.permute.xlu0 %434 }
  0x8f   : > { %v741_v6 = vpop.permute.xlu2 %740 }
  0x96   : > { %v417_v21 = vpop.permute.xlu1 %416  ;;  %v437_v22 = vpop.permute.xlu0 %436 }
  0x97   : > { %v421_v26 = vsel %vm420_vm1, %v415_v7, %v417_v21  ;;  %v422_v27 = vsel %vm420_vm1, %v417_v21, %v415_v7  ;;  %v439_v28 = vsel %vm438_vm2, %v435_v8, %v437_v22  ;;  %v440_v29 = vsel %vm438_vm2, %v437_v22, %v435_v8 }
  0x98   : > { %v448_v30 = vmul.f32 %v2319_v17, %v440_v29  ;;  %v449_v31 = vmul.f32 %v2321_v18, %v439_v28  ;;  %v429_v32 = vmul.f32 %v2323_v19, %v422_v27  ;;  %v430_v33 = vmul.f32 %v2325_v20, %v421_v26 }
  0x9a   : > { %v450_v36 = vpack.c.bf16 %v448_v30, %v448_v30  ;;  %v451_v37 = vpack.c.bf16 %v449_v31, %v449_v31  ;;  %v431_v38 = vpack.c.bf16 %v429_v32, %v429_v32  ;;  %v432_v39 = vpack.c.bf16 %v430_v33, %v430_v33  ;;  %v1932_v32 = vld [vmem:[%s2878_s2 + $0x8] sm:$0xf]  ;;  %v1936_v33 = vld [vmem:[%s2878_s2 + $0xc] sm:$0xf] }
  0x9b   : > { %v2411_v30 = vperm.slane %v1950_v23, 0  ;;  %v2413_v31 = vperm.slane %v1950_v23, 1 }
  0x9c   : > { %v460_v44 = vsel %vm458_vm3, %v450_v36, 0  ;;  %v463_v45 = vsel %vm458_vm3, %v451_v37, 0  ;;  %v495_v46 = vsel %vm458_vm3, %v431_v38, 0  ;;  %v498_v47 = vsel %vm458_vm3, %v432_v39, 0 }
  0x9d   : > { %472 = vmatpush.bf16.msra.mxu0 %v460_v44  ;;  %485 = vmatpush.bf16.msra.mxu1 %v463_v45  ;;  %v1954_v44 = vld [vmem:[%s2877_s1 + $0x10] sm:$0x3] }
  0x9e   : > { %507 = vmatpush.bf16.msra.mxu2 %v495_v46  ;;  %520 = vmatpush.bf16.msra.mxu3 %v498_v47  ;;  %v586_v51 = vpop.permute.xlu1 %585  ;;  %v584_v52 = vpop.permute.xlu0 %583 }
  0x9f   : > { %v588_v53 = vsel %vm587_vm4, %v584_v52, %v586_v51  ;;  %v589_v54 = vsel %vm587_vm4, %v586_v51, %v584_v52  ;;  %v2441_v51 = vperm.slane %v1954_v44, 1 }
  0xa0   : > { %1927 = vmatmul.msk.bf16.vlgmr.msra.gmra.mxu0 %vm454_vm5, %v1926_v49  ;;  %1928 = vmatmul.msk.bf16.vlgmr.msra.gmra.mxu1 %vm454_vm5, %v1926_v49  ;;  %v597_v57 = vmul.f32 %v2343_v34, %v589_v54  ;;  %v598_v58 = vmul.f32 %v2345_v35, %v588_v53  ;;  %v853_v49 = vpop.permute.xlu2 %852 }
  0xa1   : > { %562 = vmatpush.bf16.msrb.mxu0 %v550_v40  ;;  %575 = vmatpush.bf16.msrb.mxu1 %v553_v41 }
  0xa2   : > { %1929 = vmatmul.msk.bf16.vlgmr.msra.gmra.mxu2 %vm454_vm5, %v433_v50  ;;  %1930 = vmatmul.msk.bf16.vlgmr.msra.gmra.mxu3 %vm454_vm5, %v433_v50  ;;  %v599_v61 = vpack.c.bf16 %v597_v57, %v597_v57  ;;  %v600_v62 = vpack.c.bf16 %v598_v58, %v598_v58  ;;  %v2439_v50 = vperm.slane %v1954_v44, 0 }
  0xa4   : > { %v607_v1 = vsel %vm458_vm3, %v599_v61, 0  ;;  %v610_v2 = vsel %vm458_vm3, %v600_v62, 0 }
  0xa5   : > { %660 = vmatpush.bf16.msra.mxu0 %v648_v55  ;;  %673 = vmatpush.bf16.msra.mxu1 %v651_v56 }
  0xa6   : > { %619 = vmatpush.bf16.msrb.mxu2 %v607_v1  ;;  %632 = vmatpush.bf16.msrb.mxu3 %v610_v2  ;;  %v684_v7 = vpop.permute.xlu0 %683  ;;  %v739_v8 = vpop.permute.xlu1 %738  ;;  %v909_v1 = vld [vmem:[%s2845_s3] sm:$0xff]  ;;  %v2139_v2 = vmov 0  }
  0xa7   : > { %v686_v11 = vsel %vm685_vm6, %v682_v48, %v684_v7  ;;  %v687_v12 = vsel %vm685_vm6, %v684_v7, %v682_v48  ;;  %v743_v13 = vsel %vm742_vm7, %v739_v8, %v741_v6  ;;  %v744_v14 = vsel %vm742_vm7, %v741_v6, %v739_v8  ;;  %2063 = vset.pattern.permute.xlu1 %v2139_v2  ;;  %v1947_v6 = vld [vmem:[%s2878_s2 + $0x18] sm:$0xf]  ;;  %v1951_v7 = vld [vmem:[%s2878_s2 + $0x1c] sm:$0xf]  ;;  %v1955_v8 = vld [vmem:[%s2878_s2 + $0x20] sm:$0xf] }
  0xa8   : > { %v695_v15 = vmul.f32 %v2382_v63, %v686_v11  ;;  %v696_v16 = vmul.f32 %v2384_v0, %v687_v12  ;;  %v752_v21 = vmul.f32 %v2389_v3, %v743_v13  ;;  %v753_v22 = vmul.f32 %v2391_v5, %v744_v14  ;;  %2064 = vset.pattern.permute.xlu0 %v2139_v2 }
  0xa9   : > { %912 = vperm.xlu1 %2063, %v909_v1  }
  0xaa   : > { %v697_v24 = vpack.c.bf16 %v695_v15, %v695_v15  ;;  %v698_v25 = vpack.c.bf16 %v696_v16, %v696_v16  ;;  %v754_v26 = vpack.c.bf16 %v752_v21, %v752_v21  ;;  %v755_v27 = vpack.c.bf16 %v753_v22, %v753_v22 }
  0xac   : > { %v705_v28 = vsel %vm458_vm3, %v697_v24, 0  ;;  %v708_v29 = vsel %vm458_vm3, %v698_v25, 0  ;;  %v762_v40 = vsel %vm458_vm3, %v754_v26, 0  ;;  %v765_v41 = vsel %vm458_vm3, %v755_v27, 0 }
  0xad   : > { %717 = vmatpush.bf16.msra.mxu2 %v705_v28  ;;  %730 = vmatpush.bf16.msra.mxu3 %v708_v29 }
  0xae   : > { %v798_v36 = vpop.permute.xlu1 %797  ;;  %v796_v37 = vpop.permute.xlu0 %795 }
  0xaf   : > { %v800_v38 = vsel %vm799_vm8, %v796_v37, %v798_v36  ;;  %v801_v39 = vsel %vm799_vm8, %v798_v36, %v796_v37 }
  0xb0   : > { %1933 = vmatmul.msk.bf16.vlgmr.msrb.gmra.mxu0 %vm454_vm5, %v1932_v32  ;;  %1934 = vmatmul.msk.bf16.vlgmr.msrb.gmra.mxu1 %vm454_vm5, %v1932_v32  ;;  %v809_v42 = vmul.f32 %v2411_v30, %v800_v38  ;;  %v810_v43 = vmul.f32 %v2413_v31, %v801_v39 }
  0xb1   : > { %774 = vmatpush.bf16.msrb.mxu0 %v762_v40  ;;  %787 = vmatpush.bf16.msrb.mxu1 %v765_v41 }
  0xb2   : > { %1937 = vmatmul.msk.bf16.vlgmr.msrb.gmra.mxu2 %vm454_vm5, %v1936_v33  ;;  %1938 = vmatmul.msk.bf16.vlgmr.msrb.gmra.mxu3 %vm454_vm5, %v1936_v33  ;;  %v811_v45 = vpack.c.bf16 %v809_v42, %v809_v42  ;;  %v812_v46 = vpack.c.bf16 %v810_v43, %v810_v43 }
  0xb4   : > { %v819_v47 = vsel %vm458_vm3, %v811_v45, 0  ;;  %v822_v48 = vsel %vm458_vm3, %v812_v46, 0 }
  0xb5   : > { %831 = vmatpush.bf16.msrb.mxu2 %v819_v47  ;;  %844 = vmatpush.bf16.msrb.mxu3 %v822_v48 }
  0xb6   : > { %v855_v52 = vpop.permute.xlu0 %854 }
  0xb7   : > { %v857_v53 = vsel %vm856_vm9, %v853_v49, %v855_v52  ;;  %v858_v54 = vsel %vm856_vm9, %v855_v52, %v853_v49 }
  0xb8   : > { %v866_v55 = vmul.f32 %v2439_v50, %v857_v53  ;;  %v867_v56 = vmul.f32 %v2441_v51, %v858_v54 }
  0xba   : > { %v868_v57 = vpack.c.bf16 %v866_v55, %v866_v55  ;;  %v869_v58 = vpack.c.bf16 %v867_v56, %v867_v56 }
  0xbc   : > { %v876_v61 = vsel %vm458_vm3, %v868_v57, 0  ;;  %v879_v62 = vsel %vm458_vm3, %v869_v58, 0 }
  0xc0   : > { %1940 = vmatmul.msk.bf16.vlgmr.msra.gmra.mxu0 %vm454_vm5, %v1939_v59  ;;  %1941 = vmatmul.msk.bf16.vlgmr.msra.gmra.mxu1 %vm454_vm5, %v1939_v59 }
  0xc1   : > { %888 = vmatpush.bf16.msra.mxu0 %v876_v61  ;;  %901 = vmatpush.bf16.msra.mxu1 %v879_v62 }
  0xc2   : > { %1944 = vmatmul.msk.bf16.vlgmr.msra.gmra.mxu2 %vm454_vm5, %v1943_v60  ;;  %1945 = vmatmul.msk.bf16.vlgmr.msra.gmra.mxu3 %vm454_vm5, %v1943_v60 }
  0xd0   : > { %1948 = vmatmul.msk.bf16.vlgmr.msrb.gmra.mxu0 %vm454_vm5, %v1947_v6  ;;  %1949 = vmatmul.msk.bf16.vlgmr.msrb.gmra.mxu1 %vm454_vm5, %v1947_v6 }
  0xd2   : > { %1952 = vmatmul.msk.bf16.vlgmr.msrb.gmra.mxu2 %vm454_vm5, %v1951_v7  ;;  %1953 = vmatmul.msk.bf16.vlgmr.msrb.gmra.mxu3 %vm454_vm5, %v1951_v7 }
  0xe0   : > { %1956 = vmatmul.msk.bf16.vlgmr.msra.gmra.mxu0 %vm454_vm5, %v1955_v8  ;;  %1957 = vmatmul.msk.bf16.vlgmr.msra.gmra.mxu1 %vm454_vm5, %v1955_v8 }
 0x11b   : > { %v913_v1 = vpop.permute.xlu1 %912 }
 0x11d   : > { %v474_v11 = vpop.f32.mrf.mxu0  ;;  %v487_v12 = vpop.f32.mrf.mxu1 }
 0x125   : > { %v509_v13 = vpop.f32.mrf.mxu2  ;;  %v522_v14 = vpop.f32.mrf.mxu3 }
 0x126   : > { %v476_v15 = vpop.f32.mrf.mxu0  ;;  %v489_v16 = vpop.f32.mrf.mxu1  ;;  %v510_v45 = vadd.f32 %v509_v13, %v474_v11  ;;  %v523_v46 = vadd.f32 %v522_v14, %v487_v12 }
 0x12d   : > { %v511_v21 = vpop.f32.mrf.mxu2  ;;  %v524_v22 = vpop.f32.mrf.mxu3 }
 0x12e   : > { %v564_v23 = vpop.f32.mrf.mxu0  ;;  %v577_v24 = vpop.f32.mrf.mxu1 }
 0x12f   : > { %v581_v47 = vadd.f32 %v564_v23, %v510_v45  ;;  %v582_v48 = vadd.f32 %v577_v24, %v523_v46 }
 0x135   : > { %v621_v25 = vpop.f32.mrf.mxu2  ;;  %v634_v26 = vpop.f32.mrf.mxu3 }
 0x136   : > { %v566_v27 = vpop.f32.mrf.mxu0  ;;  %v579_v28 = vpop.f32.mrf.mxu1  ;;  %v638_v49 = vadd.f32 %v621_v25, %v581_v47  ;;  %v639_v52 = vadd.f32 %v634_v26, %v582_v48 }
 0x13d   : > { %v623_v29 = vpop.f32.mrf.mxu2  ;;  %v636_v32 = vpop.f32.mrf.mxu3 }
 0x13e   : > { %v662_v33 = vpop.f32.mrf.mxu0  ;;  %v675_v36 = vpop.f32.mrf.mxu1 }
 0x13f   : > { %v679_v57 = vadd.f32 %v662_v33, %v638_v49  ;;  %v680_v58 = vadd.f32 %v675_v36, %v639_v52 }
 0x145   : > { %v719_v37 = vpop.f32.mrf.mxu2  ;;  %v732_v38 = vpop.f32.mrf.mxu3 }
 0x146   : > { %v664_v39 = vpop.f32.mrf.mxu0  ;;  %v677_v40 = vpop.f32.mrf.mxu1  ;;  %v736_v59 = vadd.f32 %v719_v37, %v679_v57  ;;  %v737_v60 = vadd.f32 %v732_v38, %v680_v58 }
 0x14d   : > { %v721_v41 = vpop.f32.mrf.mxu2  ;;  %v734_v42 = vpop.f32.mrf.mxu3 }
 0x14e   : > { %v776_v43 = vpop.f32.mrf.mxu0  ;;  %v789_v44 = vpop.f32.mrf.mxu1 }
 0x14f   : > { %v793_v61 = vadd.f32 %v776_v43, %v736_v59  ;;  %v794_v62 = vadd.f32 %v789_v44, %v737_v60 }
 0x155   : > { %v833_v53 = vpop.f32.mrf.mxu2  ;;  %v846_v54 = vpop.f32.mrf.mxu3 }
 0x156   : > { %v778_v55 = vpop.f32.mrf.mxu0  ;;  %v791_v56 = vpop.f32.mrf.mxu1  ;;  %v850_v2 = vadd.f32 %v833_v53, %v793_v61  ;;  %v851_v6 = vadd.f32 %v846_v54, %v794_v62  ;;  %v1958_v54 = vld [vmem:[%s2846_s4 + $0x4] sm:$0xf] }
 0x15d   : > { %v848_v7 = vpop.f32.mrf.mxu3  ;;  %v835_v8 = vpop.f32.mrf.mxu2 }
 0x15e   : > { %v890_v11 = vpop.f32.mrf.mxu0  ;;  %v903_v12 = vpop.f32.mrf.mxu1 }
 0x15f   : > { %v907_v13 = vadd.f32 %v890_v11, %v850_v2  ;;  %v908_v14 = vadd.f32 %v903_v12, %v851_v6  ;;  %v929_v11 = vld [vmem:[%s2846_s4] sm:$0xf] }
 0x161   : > { %v915_v15 = vadd.f32 %v913_v1, %v907_v13  ;;  %v916_v16 = vadd.f32 %v913_v1, %v908_v14 }
 0x163   : > { %v2479_v21 = vmax.f32 %v915_v15, 0.0  ;;  %v2481_v22 = vmax.f32 %v916_v16, 0.0 }
 0x165   : > { %932 = vrot.lane.b32.xlu0 %v2481_v22, %s2869_s26  ;;  %1012 = vrot.lane.b32.xlu1 %v2479_v21, %s2867_s28  ;;  %v1110_v46 = vpack.c.bf16 %v2479_v21, %v2479_v21  ;;  %v1111_v47 = vpack.c.bf16 %v2481_v22, %v2481_v22 }
 0x166   : > { %930 = vrot.lane.b32.xlu2 %v2479_v21, %s2869_s26  ;;  %v905_v23 = vpop.f32.mrf.mxu1  ;;  %v892_v24 = vpop.f32.mrf.mxu0  ;;  %s2886_s26 = smov 17  }
 0x167   : > { %v1118_v61 = vsel %vm458_vm3, %v1110_v46, 0  ;;  %v1121_v62 = vsel %vm458_vm3, %v1111_v47, 0 }
 0x16d   : > { %919 = vrot.lane.b32.xlu0 %v2479_v21, %s2865_s20  ;;  %921 = vrot.lane.b32.xlu1 %v2481_v22, %s2865_s20  ;;  %s2884_s20 = smov 16  }
 0x16e   : > { %1014 = vrot.lane.b32.xlu2 %v2481_v22, %s2867_s28 }
 0x175   : > { %1063 = vrot.lane.b32.xlu0 %v2481_v22, %s2879_s15  ;;  %1200 = vrot.lane.b32.xlu1 %v2479_v21, %s2880_s19 }
 0x176   : > { %1061 = vrot.lane.b32.xlu2 %v2479_v21, %s2879_s15 }
 0x17d   : > { %1151 = vrot.lane.b32.xlu0 %v2479_v21, %s2881_s17  ;;  %1153 = vrot.lane.b32.xlu1 %v2481_v22, %s2881_s17 }
 0x17e   : > { %1202 = vrot.lane.b32.xlu2 %v2481_v22, %s2880_s19 }
 0x185   : > { %1300 = vrot.lane.b32.xlu0 %v2481_v22, %s2882_s18  ;;  %1249 = vrot.lane.b32.xlu1 %v2479_v21, %s2883_s29 }
 0x186   : > { %1298 = vrot.lane.b32.xlu2 %v2479_v21, %s2882_s18 }
 0x18e   : > { %1251 = vrot.lane.b32.xlu2 %v2481_v22, %s2883_s29 }
 0x1c0   : > { %v931_v25 = vpop.permute.xlu2 %930 }
 0x1c8   : > { %v1015_v26 = vpop.permute.xlu2 %1014 }
 0x1d0   : > { %v1062_v29 = vpop.permute.xlu2 %1061 }
 0x1d7   : > { %v933_v27 = vpop.permute.xlu0 %932  ;;  %v1013_v28 = vpop.permute.xlu1 %1012 }
 0x1d8   : > { %v934_v32 = vsel %vm438_vm2, %v931_v25, %v933_v27  ;;  %v935_v33 = vsel %vm438_vm2, %v933_v27, %v931_v25  ;;  %v1016_v36 = vsel %vm530_vm0, %v1013_v28, %v1015_v26  ;;  %v1017_v37 = vsel %vm530_vm0, %v1015_v26, %v1013_v28  ;;  %v1203_v1 = vpop.permute.xlu2 %1202 }
 0x1d9   : > { %v936_v38 = vmul.f32 %v935_v33, %v2319_v17  ;;  %v937_v39 = vmul.f32 %v934_v32, %v2321_v18  ;;  %v1018_v40 = vmul.f32 %v1017_v37, %v2301_v9  ;;  %v1019_v41 = vmul.f32 %v1016_v36, %v2303_v10 }
 0x1db   : > { %v938_v42 = vpack.c.bf16 %v936_v38, %v936_v38  ;;  %v939_v43 = vpack.c.bf16 %v937_v39, %v937_v39  ;;  %v1020_v44 = vpack.c.bf16 %v1018_v40, %v1018_v40  ;;  %v1021_v45 = vpack.c.bf16 %v1019_v41, %v1019_v41  ;;  %v1963_v39 = vld [vmem:[%s2846_s4 + $0x8] sm:$0xf] }
 0x1dd   : > { %v946_v48 = vsel %vm458_vm3, %v938_v42, 0  ;;  %v949_v49 = vsel %vm458_vm3, %v939_v43, 0  ;;  %v1028_v52 = vsel %vm458_vm3, %v1020_v44, 0  ;;  %v1031_v53 = vsel %vm458_vm3, %v1021_v45, 0 }
 0x1de   : > { %958 = vmatpush.bf16.msra.mxu2 %v946_v48  ;;  %971 = vmatpush.bf16.msra.mxu3 %v949_v49 }
 0x1df   : > { %v920_v55 = vpop.permute.xlu0 %919  ;;  %v922_v56 = vpop.permute.xlu1 %921 }
 0x1e0   : > { %v923_v57 = vsel %vm420_vm1, %v920_v55, %v922_v56  ;;  %v924_v58 = vsel %vm420_vm1, %v922_v56, %v920_v55  ;;  %v1299_v32 = vpop.permute.xlu2 %1298  ;;  %v1966_v55 = vld [vmem:[%s2846_s4 + $0xc] sm:$0xf] }
 0x1e1   : > { %v925_v59 = vmul.f32 %v924_v58, %v2323_v19  ;;  %v926_v60 = vmul.f32 %v923_v57, %v2325_v20  ;;  %1959 = vmatmul.msk.bf16.vlgmr.msra.gmra.mxu2 %vm454_vm5, %v1958_v54  ;;  %1960 = vmatmul.msk.bf16.vlgmr.msra.gmra.mxu3 %vm454_vm5, %v1958_v54 }
 0x1e2   : > { %1040 = vmatpush.bf16.msrb.mxu2 %v1028_v52  ;;  %1053 = vmatpush.bf16.msrb.mxu3 %v1031_v53 }
 0x1e3   : > { %v927_v2 = vpack.c.bf16 %v925_v59, %v925_v59  ;;  %v928_v6 = vpack.c.bf16 %v926_v60, %v926_v60 }
 0x1e5   : > { %v981_v7 = vsel %vm458_vm3, %v927_v2, 0  ;;  %v984_v8 = vsel %vm458_vm3, %v928_v6, 0 }
 0x1e6   : > { %1130 = vmatpush.bf16.msra.mxu2 %v1118_v61  ;;  %1143 = vmatpush.bf16.msra.mxu3 %v1121_v62 }
 0x1e7   : > { %993 = vmatpush.bf16.msrb.mxu0 %v981_v7  ;;  %1006 = vmatpush.bf16.msrb.mxu1 %v984_v8  ;;  %v1064_v12 = vpop.permute.xlu0 %1063  ;;  %v1201_v13 = vpop.permute.xlu1 %1200 }
 0x1e8   : > { %v1065_v14 = vsel %vm587_vm4, %v1062_v29, %v1064_v12  ;;  %v1066_v15 = vsel %vm587_vm4, %v1064_v12, %v1062_v29  ;;  %v1204_v16 = vsel %vm742_vm7, %v1201_v13, %v1203_v1  ;;  %v1205_v23 = vsel %vm742_vm7, %v1203_v1, %v1201_v13  ;;  %v1252_v54 = vpop.permute.xlu2 %1251 }
 0x1e9   : > { %v1067_v24 = vmul.f32 %v1066_v15, %v2343_v34  ;;  %v1068_v25 = vmul.f32 %v1065_v14, %v2345_v35  ;;  %v1206_v26 = vmul.f32 %v1204_v16, %v2389_v3  ;;  %v1207_v27 = vmul.f32 %v1205_v23, %v2391_v5  ;;  %v1969_v15 = vld [vmem:[%s2846_s4 + $0x10] sm:$0xf] }
 0x1ea   : > { %1961 = vmatmul.msk.bf16.vlgmr.msrb.gmra.mxu0 %vm454_vm5, %v929_v11  ;;  %1962 = vmatmul.msk.bf16.vlgmr.msrb.gmra.mxu1 %vm454_vm5, %v929_v11 }
 0x1eb   : > { %v1069_v28 = vpack.c.bf16 %v1067_v24, %v1067_v24  ;;  %v1070_v29 = vpack.c.bf16 %v1068_v25, %v1068_v25  ;;  %v1208_v33 = vpack.c.bf16 %v1206_v26, %v1206_v26  ;;  %v1209_v36 = vpack.c.bf16 %v1207_v27, %v1207_v27  ;;  %v1347_v24 = vld [vmem:[%s2847_s5] sm:$0xff]  ;;  %v1972_v25 = vld [vmem:[%s2846_s4 + $0x14] sm:$0xf]  ;;  %v1975_v26 = vld [vmem:[%s2846_s4 + $0x18] sm:$0xf] }
 0x1ec   : > { %1350 = vperm.xlu0 %2064, %v1347_v24   ;;  %v1978_v27 = vld [vmem:[%s2846_s4 + $0x1c] sm:$0xf] }
 0x1ed   : > { %v1077_v37 = vsel %vm458_vm3, %v1069_v28, 0  ;;  %v1080_v38 = vsel %vm458_vm3, %v1070_v29, 0  ;;  %v1216_v46 = vsel %vm458_vm3, %v1208_v33, 0  ;;  %v1219_v47 = vsel %vm458_vm3, %v1209_v36, 0  ;;  %v1981_v28 = vld [vmem:[%s2846_s4 + $0x20] sm:$0xf] }
 0x1ee   : > { %1089 = vmatpush.bf16.msra.mxu0 %v1077_v37  ;;  %1102 = vmatpush.bf16.msra.mxu1 %v1080_v38 }
 0x1ef   : > { %v1152_v40 = vpop.permute.xlu0 %1151  ;;  %v1154_v41 = vpop.permute.xlu1 %1153 }
 0x1f0   : > { %v1155_v42 = vsel %vm685_vm6, %v1152_v40, %v1154_v41  ;;  %v1156_v43 = vsel %vm685_vm6, %v1154_v41, %v1152_v40 }
 0x1f1   : > { %v1157_v44 = vmul.f32 %v1155_v42, %v2382_v63  ;;  %v1158_v45 = vmul.f32 %v1156_v43, %v2384_v0  ;;  %1964 = vmatmul.msk.bf16.vlgmr.msrb.gmra.mxu2 %vm454_vm5, %v1963_v39  ;;  %1965 = vmatmul.msk.bf16.vlgmr.msrb.gmra.mxu3 %vm454_vm5, %v1963_v39 }
 0x1f2   : > { %1228 = vmatpush.bf16.msrb.mxu2 %v1216_v46  ;;  %1241 = vmatpush.bf16.msrb.mxu3 %v1219_v47 }
 0x1f3   : > { %v1159_v48 = vpack.c.bf16 %v1157_v44, %v1157_v44  ;;  %v1160_v49 = vpack.c.bf16 %v1158_v45, %v1158_v45 }
 0x1f5   : > { %v1167_v52 = vsel %vm458_vm3, %v1159_v48, 0  ;;  %v1170_v53 = vsel %vm458_vm3, %v1160_v49, 0 }
 0x1f6   : > { %1179 = vmatpush.bf16.msrb.mxu0 %v1167_v52  ;;  %1192 = vmatpush.bf16.msrb.mxu1 %v1170_v53 }
 0x1f7   : > { %v1301_v56 = vpop.permute.xlu0 %1300  ;;  %v1250_v57 = vpop.permute.xlu1 %1249 }
 0x1f8   : > { %v1302_v58 = vsel %vm856_vm9, %v1299_v32, %v1301_v56  ;;  %v1303_v59 = vsel %vm856_vm9, %v1301_v56, %v1299_v32  ;;  %v1253_v60 = vsel %vm799_vm8, %v1250_v57, %v1252_v54  ;;  %v1254_v61 = vsel %vm799_vm8, %v1252_v54, %v1250_v57 }
 0x1f9   : > { %v1304_v62 = vmul.f32 %v1302_v58, %v2439_v50  ;;  %v1305_v1 = vmul.f32 %v1303_v59, %v2441_v51  ;;  %v1255_v2 = vmul.f32 %v1253_v60, %v2411_v30  ;;  %v1256_v6 = vmul.f32 %v1254_v61, %v2413_v31 }
 0x1fa   : > { %1967 = vmatmul.msk.bf16.vlgmr.msra.gmra.mxu0 %vm454_vm5, %v1966_v55  ;;  %1968 = vmatmul.msk.bf16.vlgmr.msra.gmra.mxu1 %vm454_vm5, %v1966_v55 }
 0x1fb   : > { %v1257_v7 = vpack.c.bf16 %v1255_v2, %v1255_v2  ;;  %v1258_v8 = vpack.c.bf16 %v1256_v6, %v1256_v6  ;;  %v1306_v11 = vpack.c.bf16 %v1304_v62, %v1304_v62  ;;  %v1307_v12 = vpack.c.bf16 %v1305_v1, %v1305_v1 }
 0x1fd   : > { %v1265_v13 = vsel %vm458_vm3, %v1257_v7, 0  ;;  %v1268_v14 = vsel %vm458_vm3, %v1258_v8, 0  ;;  %v1314_v16 = vsel %vm458_vm3, %v1306_v11, 0  ;;  %v1317_v23 = vsel %vm458_vm3, %v1307_v12, 0 }
 0x1fe   : > { %1277 = vmatpush.bf16.msra.mxu0 %v1265_v13  ;;  %1290 = vmatpush.bf16.msra.mxu1 %v1268_v14 }
 0x201   : > { %1970 = vmatmul.msk.bf16.vlgmr.msra.gmra.mxu2 %vm454_vm5, %v1969_v15  ;;  %1971 = vmatmul.msk.bf16.vlgmr.msra.gmra.mxu3 %vm454_vm5, %v1969_v15 }
 0x202   : > { %1326 = vmatpush.bf16.msra.mxu2 %v1314_v16  ;;  %1339 = vmatpush.bf16.msra.mxu3 %v1317_v23 }
 0x20a   : > { %1973 = vmatmul.msk.bf16.vlgmr.msrb.gmra.mxu0 %vm454_vm5, %v1972_v25  ;;  %1974 = vmatmul.msk.bf16.vlgmr.msrb.gmra.mxu1 %vm454_vm5, %v1972_v25 }
 0x211   : > { %1976 = vmatmul.msk.bf16.vlgmr.msrb.gmra.mxu2 %vm454_vm5, %v1975_v26  ;;  %1977 = vmatmul.msk.bf16.vlgmr.msrb.gmra.mxu3 %vm454_vm5, %v1975_v26 }
 0x21a   : > { %1979 = vmatmul.msk.bf16.vlgmr.msra.gmra.mxu0 %vm454_vm5, %v1978_v27  ;;  %1980 = vmatmul.msk.bf16.vlgmr.msra.gmra.mxu1 %vm454_vm5, %v1978_v27 }
 0x221   : > { %1982 = vmatmul.msk.bf16.vlgmr.msra.gmra.mxu2 %vm454_vm5, %v1981_v28  ;;  %1983 = vmatmul.msk.bf16.vlgmr.msra.gmra.mxu3 %vm454_vm5, %v1981_v28 }
 0x264   : > { %v960_v29 = vpop.f32.mrf.mxu2  ;;  %v973_v32 = vpop.f32.mrf.mxu3 }
 0x267   : > { %v995_v33 = vpop.f32.mrf.mxu0  ;;  %v1008_v36 = vpop.f32.mrf.mxu1 }
 0x268   : > { %v1009_v58 = vadd.f32 %v1008_v36, %v973_v32  ;;  %v996_v60 = vadd.f32 %v995_v33, %v960_v29  ;;  %v1351_v32 = vpop.permute.xlu0 %1350 }
 0x26c   : > { %v962_v37 = vpop.f32.mrf.mxu2  ;;  %v975_v38 = vpop.f32.mrf.mxu3 }
 0x26f   : > { %v997_v39 = vpop.f32.mrf.mxu0  ;;  %v1010_v40 = vpop.f32.mrf.mxu1 }
 0x274   : > { %v1042_v41 = vpop.f32.mrf.mxu2  ;;  %v1055_v42 = vpop.f32.mrf.mxu3 }
 0x275   : > { %v1059_v61 = vadd.f32 %v1042_v41, %v996_v60  ;;  %v1060_v62 = vadd.f32 %v1055_v42, %v1009_v58 }
 0x277   : > { %v1091_v43 = vpop.f32.mrf.mxu0  ;;  %v1104_v44 = vpop.f32.mrf.mxu1 }
 0x278   : > { %v1108_v7 = vadd.f32 %v1091_v43, %v1059_v61  ;;  %v1109_v8 = vadd.f32 %v1104_v44, %v1060_v62  ;;  %v1984_v62 = vld [vmem:[%s2848_s6 + $0x4] sm:$0xf] }
 0x27c   : > { %v1044_v45 = vpop.f32.mrf.mxu2  ;;  %v1057_v46 = vpop.f32.mrf.mxu3 }
 0x27d   : > { %v1785_v45 = vld [vmem:[%s2849_s7] sm:$0xff] }
 0x27f   : > { %v1093_v47 = vpop.f32.mrf.mxu0  ;;  %v1106_v48 = vpop.f32.mrf.mxu1 }
 0x284   : > { %v1132_v49 = vpop.f32.mrf.mxu2  ;;  %v1145_v52 = vpop.f32.mrf.mxu3 }
 0x285   : > { %v1149_v12 = vadd.f32 %v1132_v49, %v1108_v7  ;;  %v1150_v13 = vadd.f32 %v1145_v52, %v1109_v8 }
 0x287   : > { %v1181_v53 = vpop.f32.mrf.mxu0  ;;  %v1194_v54 = vpop.f32.mrf.mxu1 }
 0x288   : > { %v1198_v16 = vadd.f32 %v1181_v53, %v1149_v12  ;;  %v1199_v23 = vadd.f32 %v1194_v54, %v1150_v13 }
 0x28c   : > { %v1134_v55 = vpop.f32.mrf.mxu2  ;;  %v1147_v56 = vpop.f32.mrf.mxu3 }
 0x28f   : > { %v1183_v57 = vpop.f32.mrf.mxu0  ;;  %v1196_v59 = vpop.f32.mrf.mxu1 }
 0x294   : > { %v1230_v1 = vpop.f32.mrf.mxu2  ;;  %v1243_v2 = vpop.f32.mrf.mxu3 }
 0x295   : > { %v1247_v25 = vadd.f32 %v1230_v1, %v1198_v16  ;;  %v1248_v26 = vadd.f32 %v1243_v2, %v1199_v23 }
 0x297   : > { %v1279_v6 = vpop.f32.mrf.mxu0  ;;  %v1292_v11 = vpop.f32.mrf.mxu1 }
 0x298   : > { %v1296_v28 = vadd.f32 %v1279_v6, %v1247_v25  ;;  %v1297_v29 = vadd.f32 %v1292_v11, %v1248_v26 }
 0x29c   : > { %v1232_v14 = vpop.f32.mrf.mxu2  ;;  %v1245_v15 = vpop.f32.mrf.mxu3 }
 0x29f   : > { %v1281_v24 = vpop.f32.mrf.mxu0  ;;  %v1294_v27 = vpop.f32.mrf.mxu1 }
 0x2a4   : > { %v1328_v33 = vpop.f32.mrf.mxu2  ;;  %v1341_v36 = vpop.f32.mrf.mxu3 }
 0x2a5   : > { %v1345_v37 = vadd.f32 %v1328_v33, %v1296_v28  ;;  %v1346_v38 = vadd.f32 %v1341_v36, %v1297_v29 }
 0x2a7   : > { %v1353_v39 = vadd.f32 %v1351_v32, %v1345_v37  ;;  %v1354_v40 = vadd.f32 %v1351_v32, %v1346_v38 }
 0x2a9   : > { %v2633_v41 = vmax.f32 %v1353_v39, 0.0  ;;  %v2635_v42 = vmax.f32 %v1354_v40, 0.0 }
 0x2ab   : > { %1370 = vrot.lane.b32.xlu2 %v2635_v42, %s2884_s20  ;;  %1450 = vrot.lane.b32.xlu0 %v2633_v41, %s2885_s16  ;;  %v1549_v33 = vpack.c.bf16 %v2635_v42, %v2635_v42  ;;  %v1548_v36 = vpack.c.bf16 %v2633_v41, %v2633_v41 }
 0x2ac   : > { %1368 = vrot.lane.b32.xlu1 %v2633_v41, %s2884_s20  ;;  %v1330_v43 = vpop.f32.mrf.mxu2  ;;  %v1343_v44 = vpop.f32.mrf.mxu3 }
 0x2ad   : > { %v1556_v44 = vsel %vm458_vm3, %v1548_v36, 0 }
 0x2b3   : > { %1359 = vrot.lane.b32.xlu2 %v2635_v42, %s2886_s26  ;;  %1501 = vrot.lane.b32.xlu0 %v2635_v42, %s2879_s15 }
 0x2b4   : > { %1357 = vrot.lane.b32.xlu1 %v2633_v41, %s2886_s26  ;;  %s404_s26 = sand.u32 1, %s2121_s22  }
 0x2b5   : > { %s1852_s20 = scalar_lea.sflag [#allocation3], %s404_s26 }
 0x2bb   : > { %1499 = vrot.lane.b32.xlu2 %v2633_v41, %s2879_s15  ;;  %1638 = vrot.lane.b32.xlu0 %v2633_v41, %s2880_s19  ;;  %s1860_s15 = scalar_lea.hbm %s2854_s12, %s2227_s25 }
 0x2bc   : > { %1452 = vrot.lane.b32.xlu1 %v2635_v42, %s2885_s16  ;;  %s1864_s1 = sshll.u32 %s1860_s15, 4  ;;  %s1865_s1 = int_to_ptr.hbm [resolvable:$true] %s1864_s1 }
 0x2bd   : > { %s2081_s16 = sshra.s32 %s1865_s1, 4  ;;  %s2082_s16 = int_to_ptr.hbm [resolvable:$true] %s2081_s16 }
 0x2be   : > { %s2083_s2 = scalar_lea.hbm %s2082_s16, 1  ;;  %p2088_p0 = scmp.lt.s32.totalorder %s2082_s16, %s2854_s12 }
 0x2bf   : > { %p2084_p11 = scmp.ne.s32.totalorder %s2082_s16, %s2083_s2  ;;  %p2089_p1 = scmp.lt.s32.totalorder %s2087_s0, %s2083_s2 }
 0x2c1   : > { %p2085_p12 = pnand %p2084_p11, %p2244_p5  ;;  %p2090_p2 = por %p2089_p1, %p2088_p0 }
 0x2c3   : > { %1591 = vrot.lane.b32.xlu2 %v2635_v42, %s2881_s17  ;;  %1689 = vrot.lane.b32.xlu0 %v2635_v42, %s2883_s29  ;;  %p2086_p13 = pneg %p2085_p12 }
 0x2c4   : > { %1589 = vrot.lane.b32.xlu1 %v2633_v41, %s2881_s17 }
 0x2c5   : > { %p2091_p3 = pnand %p2090_p2, %p2086_p13 }
 0x2cb   : > { %1687 = vrot.lane.b32.xlu2 %v2633_v41, %s2883_s29  ;;  %1788 = vperm.xlu0 %2064, %v1785_v45  }
 0x2cc   : > { %1640 = vrot.lane.b32.xlu1 %v2635_v42, %s2880_s19 }
 0x2d3   : > { %1738 = vrot.lane.b32.xlu2 %v2635_v42, %s2882_s18  ;;  %v1989_v42 = vld [vmem:[%s2848_s6 + $0x8] sm:$0xf] }
 0x2d4   : > { %1736 = vrot.lane.b32.xlu1 %v2633_v41, %s2882_s18  ;;  %s405_s18 = scalar_lea.vmem [#allocation2], %s404_s26 }
 0x2d5   : > { %s1862_s29 = sshll.u32 %s405_s18, 4  ;;  %s1863_s29 = int_to_ptr.vmem [resolvable:$true] %s1862_s29 }
 0x305   : > { %v1371_v46 = vpop.permute.xlu2 %1370 }
 0x30d   : > { %v1360_v47 = vpop.permute.xlu2 %1359 }
 0x315   : > { %v1500_v56 = vpop.permute.xlu2 %1499 }
 0x31d   : > { %v1451_v48 = vpop.permute.xlu0 %1450  ;;  %v1592_v16 = vpop.permute.xlu2 %1591 }
 0x31e   : > { %v1369_v49 = vpop.permute.xlu1 %1368 }
 0x31f   : > { %v1372_v52 = vsel %vm438_vm2, %v1369_v49, %v1371_v46  ;;  %v1373_v53 = vsel %vm438_vm2, %v1371_v46, %v1369_v49 }
 0x320   : > { %v1374_v54 = vmul.f32 %v1373_v53, %v2319_v17  ;;  %v1375_v55 = vmul.f32 %v1372_v52, %v2321_v18 }
 0x322   : > { %v1376_v57 = vpack.c.bf16 %v1374_v54, %v1374_v54  ;;  %v1377_v58 = vpack.c.bf16 %v1375_v55, %v1375_v55 }
 0x324   : > { %v1384_v59 = vsel %vm458_vm3, %v1376_v57, 0  ;;  %v1387_v60 = vsel %vm458_vm3, %v1377_v58, 0 }
 0x325   : > { %1396 = vmatpush.bf16.msrb.mxu0 %v1384_v59  ;;  %1409 = vmatpush.bf16.msrb.mxu1 %v1387_v60  ;;  %v1502_v61 = vpop.permute.xlu0 %1501  ;;  %v1688_v43 = vpop.permute.xlu2 %1687 }
 0x326   : > { %v1503_v1 = vsel %vm587_vm4, %v1500_v56, %v1502_v61  ;;  %v1504_v17 = vsel %vm587_vm4, %v1502_v61, %v1500_v56  ;;  %v1358_v18 = vpop.permute.xlu1 %1357 }
 0x327   : > { %v1505_v2 = vmul.f32 %v1504_v17, %v2343_v34  ;;  %v1506_v6 = vmul.f32 %v1503_v1, %v2345_v35  ;;  %v1361_v7 = vsel %vm420_vm1, %v1358_v18, %v1360_v47  ;;  %v1362_v8 = vsel %vm420_vm1, %v1360_v47, %v1358_v18 }
 0x328   : > { %v1363_v11 = vmul.f32 %v1362_v8, %v2323_v19  ;;  %v1364_v12 = vmul.f32 %v1361_v7, %v2325_v20  ;;  %1985 = vmatmul.msk.bf16.vlgmr.msrb.gmra.mxu0 %vm454_vm5, %v1984_v62  ;;  %1986 = vmatmul.msk.bf16.vlgmr.msrb.gmra.mxu1 %vm454_vm5, %v1984_v62  ;;  %v1367_v20 = vld [vmem:[%s2848_s6] sm:$0xf] }
 0x329   : > { %v1507_v13 = vpack.c.bf16 %v1505_v2, %v1505_v2  ;;  %v1508_v14 = vpack.c.bf16 %v1506_v6, %v1506_v6 }
 0x32a   : > { %v1365_v15 = vpack.c.bf16 %v1363_v11, %v1363_v11  ;;  %v1366_v34 = vpack.c.bf16 %v1364_v12, %v1364_v12 }
 0x32b   : > { %v1515_v35 = vsel %vm458_vm3, %v1507_v13, 0  ;;  %v1518_v23 = vsel %vm458_vm3, %v1508_v14, 0 }
 0x32c   : > { %v1419_v24 = vsel %vm458_vm3, %v1365_v15, 0  ;;  %v1422_v25 = vsel %vm458_vm3, %v1366_v34, 0 }
 0x32d   : > { %1431 = vmatpush.bf16.msrb.mxu2 %v1419_v24  ;;  %1444 = vmatpush.bf16.msrb.mxu3 %v1422_v25  ;;  %v1639_v19 = vpop.permute.xlu0 %1638 }
 0x32e   : > { %v1453_v26 = vpop.permute.xlu1 %1452 }
 0x32f   : > { %v1454_v27 = vsel %vm530_vm0, %v1451_v48, %v1453_v26  ;;  %v1455_v28 = vsel %vm530_vm0, %v1453_v26, %v1451_v48 }
 0x330   : > { %v1456_v29 = vmul.f32 %v1455_v28, %v2301_v9  ;;  %v1457_v32 = vmul.f32 %v1454_v27, %v2303_v10  ;;  %1987 = vmatmul.msk.bf16.vlgmr.msrb.gmra.mxu2 %vm454_vm5, %v1367_v20  ;;  %1988 = vmatmul.msk.bf16.vlgmr.msrb.gmra.mxu3 %vm454_vm5, %v1367_v20  ;;  %v1559_v10 = vsel %vm458_vm3, %v1549_v33, 0 }
 0x331   : > { %1527 = vmatpush.bf16.msra.mxu2 %v1515_v35  ;;  %1540 = vmatpush.bf16.msra.mxu3 %v1518_v23  ;;  %v2007_v23 = vld [vmem:[%s2848_s6 + $0x20] sm:$0xf] }
 0x332   : > { %v1458_v37 = vpack.c.bf16 %v1456_v29, %v1456_v29  ;;  %v1459_v38 = vpack.c.bf16 %v1457_v32, %v1457_v32 }
 0x334   : > { %v1466_v39 = vsel %vm458_vm3, %v1458_v37, 0  ;;  %v1469_v40 = vsel %vm458_vm3, %v1459_v38, 0 }
 0x335   : > { %1478 = vmatpush.bf16.msra.mxu0 %v1466_v39  ;;  %1491 = vmatpush.bf16.msra.mxu1 %v1469_v40  ;;  %v1690_v9 = vpop.permute.xlu0 %1689 }
 0x336   : > { %v1691_v41 = vsel %vm799_vm8, %v1688_v43, %v1690_v9  ;;  %v1692_v45 = vsel %vm799_vm8, %v1690_v9, %v1688_v43  ;;  %v1590_v46 = vpop.permute.xlu1 %1589 }
 0x337   : > { %v1693_v47 = vmul.f32 %v1691_v41, %v2411_v30  ;;  %v1593_v48 = vsel %vm685_vm6, %v1590_v46, %v1592_v16  ;;  %v1594_v49 = vsel %vm685_vm6, %v1592_v16, %v1590_v46  ;;  %v1694_v52 = vmul.f32 %v1692_v45, %v2413_v31 }
 0x338   : > { %v1595_v53 = vmul.f32 %v1593_v48, %v2382_v63  ;;  %v1596_v54 = vmul.f32 %v1594_v49, %v2384_v0  ;;  %1990 = vmatmul.msk.bf16.vlgmr.msra.gmra.mxu0 %vm454_vm5, %v1989_v42  ;;  %1991 = vmatmul.msk.bf16.vlgmr.msra.gmra.mxu1 %vm454_vm5, %v1989_v42  ;;  %v1992_v63 = vld [vmem:[%s2848_s6 + $0xc] sm:$0xf] }
 0x339   : > { %1581 = vmatpush.bf16.msrb.mxu1 %v1559_v10  ;;  %1568 = vmatpush.bf16.msrb.mxu0 %v1556_v44  ;;  %v1695_v57 = vpack.c.bf16 %v1693_v47, %v1693_v47  ;;  %v1696_v30 = vpack.c.bf16 %v1694_v52, %v1694_v52 }
 0x33a   : > { %v1597_v55 = vpack.c.bf16 %v1595_v53, %v1595_v53  ;;  %v1598_v56 = vpack.c.bf16 %v1596_v54, %v1596_v54 }
 0x33b   : > { %v1703_v1 = vsel %vm458_vm3, %v1695_v57, 0  ;;  %v1706_v17 = vsel %vm458_vm3, %v1696_v30, 0 }
 0x33c   : > { %v1605_v58 = vsel %vm458_vm3, %v1597_v55, 0  ;;  %v1608_v59 = vsel %vm458_vm3, %v1598_v56, 0 }
 0x33d   : > { %1617 = vmatpush.bf16.msrb.mxu2 %v1605_v58  ;;  %1630 = vmatpush.bf16.msrb.mxu3 %v1608_v59 }
 0x33e   : > { %v1641_v31 = vpop.permute.xlu1 %1640 }
 0x33f   : > { %v1642_v0 = vsel %vm742_vm7, %v1639_v19, %v1641_v31  ;;  %v1643_v60 = vsel %vm742_vm7, %v1641_v31, %v1639_v19 }
 0x340   : > { %v1644_v61 = vmul.f32 %v1642_v0, %v2389_v3  ;;  %v1645_v62 = vmul.f32 %v1643_v60, %v2391_v5  ;;  %1993 = vmatmul.msk.bf16.vlgmr.msra.gmra.mxu2 %vm454_vm5, %v1992_v63  ;;  %1994 = vmatmul.msk.bf16.vlgmr.msra.gmra.mxu3 %vm454_vm5, %v1992_v63  ;;  %v1995_v3 = vld [vmem:[%s2848_s6 + $0x10] sm:$0xf]  ;;  %v1739_v5 = vpop.permute.xlu2 %1738 }
 0x341   : > { %1715 = vmatpush.bf16.msra.mxu2 %v1703_v1  ;;  %1728 = vmatpush.bf16.msra.mxu3 %v1706_v17 }
 0x342   : > { %v1646_v18 = vpack.c.bf16 %v1644_v61, %v1644_v61  ;;  %v1647_v2 = vpack.c.bf16 %v1645_v62, %v1645_v62 }
 0x344   : > { %v1654_v6 = vsel %vm458_vm3, %v1646_v18, 0  ;;  %v1657_v7 = vsel %vm458_vm3, %v1647_v2, 0 }
 0x345   : > { %1666 = vmatpush.bf16.msra.mxu0 %v1654_v6  ;;  %1679 = vmatpush.bf16.msra.mxu1 %v1657_v7 }
 0x346   : > { %v1737_v8 = vpop.permute.xlu1 %1736 }
 0x347   : > { %v1740_v11 = vsel %vm856_vm9, %v1737_v8, %v1739_v5  ;;  %v1741_v12 = vsel %vm856_vm9, %v1739_v5, %v1737_v8  ;;  %v1789_v5 = vpop.permute.xlu0 %1788 }
 0x348   : > { %v1742_v13 = vmul.f32 %v1740_v11, %v2439_v50  ;;  %v1743_v14 = vmul.f32 %v1741_v12, %v2441_v51  ;;  %1996 = vmatmul.msk.bf16.vlgmr.msrb.gmra.mxu0 %vm454_vm5, %v1995_v3  ;;  %1997 = vmatmul.msk.bf16.vlgmr.msrb.gmra.mxu1 %vm454_vm5, %v1995_v3  ;;  %v2001_v50 = vld [vmem:[%s2848_s6 + $0x18] sm:$0xf]  ;;  %v2004_v51 = vld [vmem:[%s2848_s6 + $0x1c] sm:$0xf] }
 0x34a   : > { %v1744_v15 = vpack.c.bf16 %v1742_v13, %v1742_v13  ;;  %v1745_v34 = vpack.c.bf16 %v1743_v14, %v1743_v14 }
 0x34c   : > { %v1752_v16 = vsel %vm458_vm3, %v1744_v15, 0  ;;  %v1755_v35 = vsel %vm458_vm3, %v1745_v34, 0 }
 0x34d   : > { %1764 = vmatpush.bf16.msrb.mxu0 %v1752_v16  ;;  %1777 = vmatpush.bf16.msrb.mxu1 %v1755_v35 }
 0x350   : > { %1999 = vmatmul.msk.bf16.vlgmr.msrb.gmra.mxu2 %vm454_vm5, %v1998_v4  ;;  %2000 = vmatmul.msk.bf16.vlgmr.msrb.gmra.mxu3 %vm454_vm5, %v1998_v4 }
 0x358   : > { %2002 = vmatmul.msk.bf16.vlgmr.msra.gmra.mxu0 %vm454_vm5, %v2001_v50  ;;  %2003 = vmatmul.msk.bf16.vlgmr.msra.gmra.mxu1 %vm454_vm5, %v2001_v50 }
 0x360   : > { %2005 = vmatmul.msk.bf16.vlgmr.msra.gmra.mxu2 %vm454_vm5, %v2004_v51  ;;  %2006 = vmatmul.msk.bf16.vlgmr.msra.gmra.mxu3 %vm454_vm5, %v2004_v51  ;;  %v2140_v51 = vmov 256.0  }
 0x361   : > { %2065 = vrcp.f32 %v2140_v51 }
 0x368   : > { %2008 = vmatmul.msk.bf16.vlgmr.msrb.gmra.mxu0 %vm454_vm5, %v2007_v23  ;;  %2009 = vmatmul.msk.bf16.vlgmr.msrb.gmra.mxu1 %vm454_vm5, %v2007_v23  ;;  %v2066_v23 = vpop.eup %2065 }
 0x369   : > { %vm1805_vm10 = vweird.f32 %v2066_v23 }
 0x3a5   : > { %v1398_v24 = vpop.f32.mrf.mxu0  ;;  %v1411_v25 = vpop.f32.mrf.mxu1 }
 0x3ad   : > { %v1400_v19 = vpop.f32.mrf.mxu0  ;;  %v1413_v20 = vpop.f32.mrf.mxu1 }
 0x3ae   : > { %v1822_v19 = vld [vmem:[%s2852_s10 + $0x8] sm:$0xff]  ;;  %v1821_v20 = vld [vmem:[%s2852_s10] sm:$0xff] }
 0x3b3   : > { %v1433_v26 = vpop.f32.mrf.mxu2  ;;  %v1446_v27 = vpop.f32.mrf.mxu3 }
 0x3b4   : > { %v1434_v41 = vadd.f32 %v1433_v26, %v1398_v24  ;;  %v1447_v45 = vadd.f32 %v1446_v27, %v1411_v25  ;;  %v1801_v24 = vmul.f32 256.0, %v2066_v23  ;;  %v1824_v25 = vld [vmem:[%s2852_s10 + $0x18] sm:$0xff] }
 0x3b5   : > { %v1480_v28 = vpop.f32.mrf.mxu0  ;;  %v1493_v29 = vpop.f32.mrf.mxu1  ;;  %1841 = vmatpush.msrb.mxu2 %v1824_v25 }
 0x3b6   : > { %v1497_v52 = vadd.f32 %v1480_v28, %v1434_v41  ;;  %v1498_v53 = vadd.f32 %v1493_v29, %v1447_v45  ;;  %v1808_v29 = vld [vmem:[%s2850_s8] sm:$0xff] }
 0x3b7   : > { %v1825_v45 = vld [vmem:[%s2853_s11] sm:$0x1] }
 0x3bb   : > { %v1435_v32 = vpop.f32.mrf.mxu2  ;;  %v1448_v33 = vpop.f32.mrf.mxu3 }
 0x3bd   : > { %v1482_v36 = vpop.f32.mrf.mxu0  ;;  %v1495_v37 = vpop.f32.mrf.mxu1 }
 0x3c3   : > { %v1529_v38 = vpop.f32.mrf.mxu2  ;;  %v1542_v39 = vpop.f32.mrf.mxu3 }
 0x3c4   : > { %v1546_v54 = vadd.f32 %v1529_v38, %v1497_v52  ;;  %v1547_v55 = vadd.f32 %v1542_v39, %v1498_v53 }
 0x3c5   : > { %v1570_v40 = vpop.f32.mrf.mxu0  ;;  %v1583_v43 = vpop.f32.mrf.mxu1 }
 0x3c6   : > { %v1587_v30 = vadd.f32 %v1570_v40, %v1546_v54  ;;  %v1588_v58 = vadd.f32 %v1583_v43, %v1547_v55 }
 0x3cb   : > { %v1531_v9 = vpop.f32.mrf.mxu2  ;;  %v1544_v10 = vpop.f32.mrf.mxu3 }
 0x3cc   : > { %v1818_v10 = vld [vmem:[%s2851_s9] sm:$0x1] }
 0x3cd   : > { %v1572_v44 = vpop.f32.mrf.mxu0  ;;  %v1585_v42 = vpop.f32.mrf.mxu1 }
 0x3d3   : > { %v1619_v46 = vpop.f32.mrf.mxu2  ;;  %v1632_v47 = vpop.f32.mrf.mxu3 }
 0x3d4   : > { %v1636_v31 = vadd.f32 %v1619_v46, %v1587_v30  ;;  %v1637_v0 = vadd.f32 %v1632_v47, %v1588_v58 }
 0x3d5   : > { %v1668_v48 = vpop.f32.mrf.mxu0  ;;  %v1681_v49 = vpop.f32.mrf.mxu1 }
 0x3d6   : > { %v1685_v60 = vadd.f32 %v1668_v48, %v1636_v31  ;;  %v1686_v61 = vadd.f32 %v1681_v49, %v1637_v0 }
 0x3db   : > { %v1621_v56 = vpop.f32.mrf.mxu2  ;;  %v1634_v57 = vpop.f32.mrf.mxu3 }
 0x3dd   : > { %v1670_v59 = vpop.f32.mrf.mxu0  ;;  %v1683_v63 = vpop.f32.mrf.mxu1 }
 0x3e3   : > { %v1717_v62 = vpop.f32.mrf.mxu2  ;;  %v1730_v1 = vpop.f32.mrf.mxu3 }
 0x3e4   : > { %v1734_v17 = vadd.f32 %v1717_v62, %v1685_v60  ;;  %v1735_v18 = vadd.f32 %v1730_v1, %v1686_v61 }
 0x3e5   : > { %v1766_v2 = vpop.f32.mrf.mxu0  ;;  %v1779_v6 = vpop.f32.mrf.mxu1 }
 0x3e6   : > { %v1783_v7 = vadd.f32 %v1766_v2, %v1734_v17  ;;  %v1784_v3 = vadd.f32 %v1779_v6, %v1735_v18 }
 0x3e8   : > { %v1791_v8 = vadd.f32 %v1789_v5, %v1783_v7  ;;  %v1792_v11 = vadd.f32 %v1789_v5, %v1784_v3 }
 0x3ea   : > { %v1793_v12 = vadd.f32 %v1791_v8, %v2479_v21  ;;  %v1794_v13 = vadd.f32 %v1792_v11, %v2481_v22  ;;  %v1823_v21 = vld [vmem:[%s2852_s10 + $0x10] sm:$0xff]  ;;  %v1802_v22 = vsub.f32 1.0, %v1801_v24 }
 0x3eb   : > { %v1719_v14 = vpop.f32.mrf.mxu2  ;;  %v1732_v15 = vpop.f32.mrf.mxu3  ;;  %1842 = vmatpush.msrb.mxu2 %v1823_v21 }
 0x3ec   : > { %v1795_v34 = vmax.f32 %v1793_v12, 0.0  ;;  %v1796_v16 = vmax.f32 %v1794_v13, 0.0  ;;  %v1803_v26 = vmul.f32 %v2066_v23, %v1802_v22 }
 0x3ed   : > { %v1768_v35 = vpop.f32.mrf.mxu0  ;;  %v1781_v4 = vpop.f32.mrf.mxu1  ;;  %1843 = vmatpush.msrb.mxu2 %v1822_v19 }
 0x3ee   : > { %v1797_v50 = vadd.f32 %v1796_v16, %v1795_v34  ;;  %v1804_v27 = vadd.f32 %v2066_v23, %v1803_v26 }
 0x3ef   : > { %1844 = vmatpush.msrb.mxu2 %v1821_v20 }
 0x3f0   : > { %1798 = vadd.xlane.f32.xlu1 %v1797_v50  ;;  %v1806_v28 = vsel %vm1805_vm10, %v2066_v23, %v1804_v27 }
 0x463   : > { %v1799_v32 = vpop.xlane.xlu1 %1798 }
 0x464   : > { %v1807_v33 = vmul.f32 %v1806_v28, %v1799_v32 }
 0x466   : > { %v1809_v36 = vmul.f32 %v1808_v29, %v1807_v33 }
 0x468   : > { %v1811_v37 = vsel %vm1810_vm11, %v1809_v36, 0.0 }
 0x469   : > { %v1812_v38 = vrot.slane %v1811_v37, 4 }
 0x46b   : > { %v1813_v39 = vadd.f32 %v1812_v38, %v1811_v37 }
 0x46d   : > { %v1814_v40 = vrot.slane %v1813_v39, 2 }
 0x46f   : > { %v1815_v43 = vadd.f32 %v1814_v40, %v1813_v39 }
 0x471   : > { %v1816_v9 = vrot.slane %v1815_v43, 1 }
 0x473   : > { %v1817_v44 = vadd.f32 %v1816_v9, %v1815_v43 }
 0x475   : > { %v1819_v42 = vadd.f32 %v1818_v10, %v1817_v44 }
 0x477   : > { %v1820_v41 = vmax.f32 %v1819_v42, 0.0 }
 0x479   : > { %2010 = vmatmul.msk.f32.vlgmr.msrb.gmra.mxu2 %vm1810_vm11, %v1820_v41 }
 0x4fc   : > { %v1846_v46 = vpop.f32.mrf.mxu2 }
 0x4fd   : > { %v1847_v47 = vadd.f32 %v1846_v46, %v1825_v45 }
 0x4ff   : > { %1850 = vst.msk [vmem:[%s405_s18] sm:$0x1] %vm1849_vm12, %v1847_v47 }
 0x500   : > { %2094 = shalt.err (!%p2091_p3)
}
 0x501   : > { %2014 = dma.vmem_to_hbm [thread:$0]  (%p2244_p5), %s1863_s29, 16, %s1865_s1, %s1852_s20  }
 0x502 PF: > { %p2020_p4 = scmp.ge.s32.totalorder %s2129_s24, 2  ;;  %s1876_s26 = sand.u32 1, %s2117_s21  }
 0x503   : > { %s1877_s17 = scalar_lea.sflag [#allocation3], %s1876_s26 }
 0x504   : > { %p2017_p7 = pnand %p2020_p4, %p2248_p6 }
 0x506   : > { %p2018_p8 = pneg %p2017_p7 }
 0x508   : > { %2112 = dma.done.wait (%p2018_p8), %s1877_s17, 16  }
 0x509   : > { %2114 = vsyncadd (%p2018_p8), %s1877_s17, 4294967280  ;;  %p22_p9 = scmp.ge.s32.totalorder %s2231_s27, 4   ;;  %s2887_s21 = smov %s2121_s22 }
 0x50a   : > { %s2888_s22 = smov %s2125_s23  ;;  %s2889_s23 = smov %s2242_s30 }
 0x50b   : > { %s2890_s24 = smov %s2231_s27  ;;  %24 = sbr.rel (!%p22_p9) target bundleno = 7 (0x7), region = 134 }
 0x510   :  { %1882 = vsyncpa [#allocation3], 1 }
 0x511   :  { %1884 = vsyncpa [#allocation3 + $0x1], 1 }

</bundles_post_ra>
